<compile_context>
chip_gen: v7x
topology: tpu7x:2x2x1
jax: 0.10.0
libtpu: 0.0.40
codegen_flags: <defaults>
</compile_context>

<pallas_src>
import numpy as np
import jax
import jax.numpy as jnp
from jax.experimental import pallas as pl
from jax.experimental.pallas import tpu as pltpu

# ----------------------------- config ("args") ------------------------------
N_AGENTS = 8
N_ACTIONS = 6
STATE_DIM = 64
UNIT_DIM = 8
N_HEAD = 4
EMBED = 32
ADV_HYPER = 64
NUM_KERNEL = 4
ATTEND_REG_COEF = 1e-3
ACTION_DIM = N_AGENTS * N_ACTIONS          # 48
SA_DIM = STATE_DIM + ACTION_DIM            # 112
IS_MINUS_ONE = True

BS = 2
T = 8

f32 = jnp.float32
bf16 = jnp.bfloat16

# --- lane-dense input slab: [state 64 | actions 48 | agent_qs 8 | max_q_i 8] ---
IN_W = STATE_DIM + ACTION_DIM + 2 * N_AGENTS      # 128
AQ0 = STATE_DIM + ACTION_DIM                      # 112
MQ0 = AQ0 + N_AGENTS                              # 120

# --- fused first-layer hidden column layout (width 1024) ---
SEL0, SEL1 = 0, N_HEAD * EMBED                    # 0:128    sel hidden (no bias)
K0, K1 = SEL1, SEL1 + NUM_KERNEL * ADV_HYPER      # 128:384  key-kernel hidden
A0, A1 = K1, K1 + NUM_KERNEL * ADV_HYPER          # 384:640  agent-kernel hidden
C0, C1 = A1, A1 + NUM_KERNEL * ADV_HYPER          # 640:896  action-kernel hidden (state+action rows)
HW0 = C1                                          # 896:928  hyper head-weight hidden
V0 = HW0 + EMBED                                  # 928:960  V hidden
ONE_COL = 1023                                    # constant-1 column (carries layer-2 biases)
H1_W = 1024

# --- fused second-layer result layout (width 384 = 3 x 128-lane groups) ---
KQT_W = N_HEAD * N_AGENTS * UNIT_DIM              # 0:256   sel∘key per (head, agent, unit)
G3 = KQT_W                                        # 256     start of third result group
KEY_OFF = 0                                       # +0:4    key kernels
AG_OFF = NUM_KERNEL                                # +4:36   agent kernels
AC_OFF = AG_OFF + NUM_KERNEL * N_AGENTS           # +36:68  action kernels
HW_OFF = AC_OFF + NUM_KERNEL * N_AGENTS           # +68:72  head weights (pre-abs)
V_OFF = HW_OFF + N_HEAD                           # +72:73  V(s)
H2_W = 384

OUT_W = 2 + 2 * N_HEAD                            # 10 : [yv | yadv | lsq*4 | ent*4]
FEAT_W = 2 * N_AGENTS + 2 * N_HEAD * N_AGENTS     # 80 : [q | adv_term | lg^2 | p*log p]

INV_SQRT_E = np.float32(1.0 / np.sqrt(EMBED))


# ------------------------------- Pallas kernel -------------------------------
def qatten_mixer_kernel(x_ref, w1_ref, b1_ref, w2_ref, r_ref,
                        gsum_ref, gbc_ref, asum_ref, wout_ref, out_ref):
    x = x_ref[...]                              # (TB, 128) f32 slab
    st = x[:, 0:STATE_DIM]                      # (TB, 64)
    aq = x[:, AQ0:AQ0 + N_AGENTS]               # (TB, 8)
    mq = x[:, MQ0:MQ0 + N_AGENTS]               # (TB, 8)

    # ---- fused first layer (bf16 MXU, f32 accumulation) + bias, relu; col ONE_COL == 1 ----
    pre = jnp.dot(x.astype(bf16), w1_ref[...], preferred_element_type=f32) + b1_ref[...]
    h_all = jnp.maximum(pre, 0.0)               # (TB, 1024)

    # ---- fused block-diagonal second layer (bf16 MXU); biases folded via const-1 column ----
    h2 = jnp.dot(h_all.astype(bf16), w2_ref[...], preferred_element_type=f32)    # (TB, 384)
    kqt = h2[:, 0:KQT_W]                        # (TB, 256) sel∘key per (head, agent, unit)
    third = h2[:, G3:H2_W]                      # (TB, 128) [key | ag | ac | hw | v | pad]
    keyk = jnp.abs(third[:, KEY_OFF:KEY_OFF + NUM_KERNEL]) + 1e-10                # (TB, 4)
    gates = jax.nn.sigmoid(third[:, AG_OFF:AC_OFF + NUM_KERNEL * N_AGENTS])       # (TB, 64)
    ag_s = gates[:, 0:NUM_KERNEL * N_AGENTS]                                      # (TB, 32)
    ac_s = gates[:, NUM_KERNEL * N_AGENTS:]                                       # (TB, 32)
    w_head = jnp.abs(third[:, HW_OFF:HW_OFF + N_HEAD])                            # (TB, 4)
    v = third[:, V_OFF:V_OFF + 1]                                                 # (TB, 1)

    # ---- attention logits, kept in f32: elementwise product + unit-group sum on the MXU ----
    st_t = jnp.concatenate([st] * N_HEAD, axis=-1)                                # (TB, 256)
    lg = jnp.dot(st_t * kqt, r_ref[...], preferred_element_type=f32)              # (TB, 32)

    # ---- per-head softmax over agents, fully vectorized ----
    sc = lg * INV_SQRT_E
    m = jnp.max(sc, axis=-1, keepdims=True)     # shared shift (softmax is shift-invariant per head)
    e = jnp.exp(sc - m)                                                            # (TB, 32)
    s = jnp.dot(e, gsum_ref[...], preferred_element_type=f32)                      # (TB, 4)
    inv_s = pl.reciprocal(s, approx=True)                                          # EUP
    p = e * jnp.dot(inv_s, gbc_ref[...], preferred_element_type=f32)               # (TB, 32)
    plogp = p * jnp.log(p + 1e-8)

    # ---- head-weighted mixing weights (weighted_head=True) ----
    whead32 = jnp.dot(w_head, gbc_ref[...], preferred_element_type=f32)            # (TB, 32)
    w_final = jnp.dot(p * whead32, asum_ref[...], preferred_element_type=f32)      # (TB, 8)
    w_abs = jnp.abs(w_final + 1e-10)
    v_rep = jnp.abs(v) * np.float32(1.0 / N_AGENTS)                                # (TB, 1)

    q = w_abs * aq + v_rep                                                         # (TB, 8)
    adv_q = w_abs * (aq - mq)                   # == q - (w_abs * mq + v_rep)

    # ---- DMAQ_SI advantage weights (vectorized over the 4 kernels) ----
    key32 = jnp.dot(keyk, gbc_ref[...], preferred_element_type=f32)                # (TB, 32)
    adv_w = jnp.dot(key32 * ag_s * ac_s, asum_ref[...], preferred_element_type=f32)  # (TB, 8)
    adv_term = adv_q * (adv_w - 1.0) if IS_MINUS_ONE else adv_q * adv_w

    # ---- single fused output matmul: [yv | yadv | lsq(4) | ent(4)] ----
    feats = jnp.concatenate([q, adv_term, lg * lg, plogp], axis=-1)                # (TB, 80)
    out_ref[...] = jnp.dot(feats, wout_ref[...], preferred_element_type=f32)


# --------------------------- weight packing (wrapper) ------------------------
def pack_params(p):
    g = lambda a: np.asarray(a, np.float32)

    # ---- fused first layer: rows = input slab [st | ac | aq | mq], 1024 hidden cols ----
    W1 = np.zeros((IN_W, H1_W), np.float32)
    B1 = np.zeros((1, H1_W), np.float32)
    selW1, kW1, aW1, cW1 = g(p["selW1"]), g(p["kW1"]), g(p["aW1"]), g(p["cW1"])
    for h in range(N_HEAD):
        W1[0:STATE_DIM, SEL0 + h * EMBED: SEL0 + (h + 1) * EMBED] = selW1[h]
    for k in range(NUM_KERNEL):
        W1[0:STATE_DIM, K0 + k * ADV_HYPER: K0 + (k + 1) * ADV_HYPER] = kW1[k]
        W1[0:STATE_DIM, A0 + k * ADV_HYPER: A0 + (k + 1) * ADV_HYPER] = aW1[k]
        W1[0:SA_DIM,   C0 + k * ADV_HYPER: C0 + (k + 1) * ADV_HYPER] = cW1[k]   # state+action rows
    W1[0:STATE_DIM, HW0:HW0 + EMBED] = g(p["hwW1"])
    W1[0:STATE_DIM, V0:V0 + EMBED] = g(p["vW1"])

    B1[0, K0:K1] = g(p["kB1"]).reshape(-1)
    B1[0, A0:A1] = g(p["aB1"]).reshape(-1)
    B1[0, C0:C1] = g(p["cB1"]).reshape(-1)
    B1[0, HW0:HW0 + EMBED] = g(p["hwB1"]).reshape(-1)
    B1[0, V0:V0 + EMBED] = g(p["vB1"]).reshape(-1)
    B1[0, ONE_COL] = 1.0                       # constant-1 hidden unit carrying layer-2 biases

    # ---- fused block-diagonal second layer (1024 -> 384) ----
    W2 = np.zeros((H1_W, H2_W), np.float32)
    selW2, keyW = g(p["selW2"]), g(p["keyW"])
    for h in range(N_HEAD):
        blk = selW2[h] @ np.tile(keyW[h].T, (1, N_AGENTS))                      # (32, 64)
        W2[SEL0 + h * EMBED: SEL0 + (h + 1) * EMBED,
           h * N_AGENTS * UNIT_DIM: (h + 1) * N_AGENTS * UNIT_DIM] = blk
    kW2, kB2 = g(p["kW2"]), g(p["kB2"])
    aW2, aB2 = g(p["aW2"]), g(p["aB2"])
    cW2, cB2 = g(p["cW2"]), g(p["cB2"])
    for k in range(NUM_KERNEL):
        W2[K0 + k * ADV_HYPER: K0 + (k + 1) * ADV_HYPER, G3 + KEY_OFF + k] = kW2[k][:, 0]
        W2[ONE_COL, G3 + KEY_OFF + k] = kB2[k, 0, 0]
        c0 = G3 + AG_OFF + k * N_AGENTS
        W2[A0 + k * ADV_HYPER: A0 + (k + 1) * ADV_HYPER, c0:c0 + N_AGENTS] = aW2[k]
        W2[ONE_COL, c0:c0 + N_AGENTS] = aB2[k, 0]
        c1 = G3 + AC_OFF + k * N_AGENTS
        W2[C0 + k * ADV_HYPER: C0 + (k + 1) * ADV_HYPER, c1:c1 + N_AGENTS] = cW2[k]
        W2[ONE_COL, c1:c1 + N_AGENTS] = cB2[k, 0]
    W2[HW0:HW0 + EMBED, G3 + HW_OFF: G3 + HW_OFF + N_HEAD] = g(p["hwW2"])
    W2[ONE_COL, G3 + HW_OFF: G3 + HW_OFF + N_HEAD] = g(p["hwB2"]).reshape(-1)
    W2[V0:V0 + EMBED, G3 + V_OFF] = g(p["vW2"])[:, 0]
    W2[ONE_COL, G3 + V_OFF] = g(p["vB2"]).reshape(-1)[0]

    # ---- 0/1 reduction / broadcast matrices (group size 8, 4 groups) ----
    R = np.zeros((KQT_W, N_HEAD * N_AGENTS), np.float32)          # unit-sum -> (head, agent)
    Gsum = np.zeros((N_HEAD * N_AGENTS, N_HEAD), np.float32)      # agent-sum per head/kernel
    Asum = np.zeros((N_HEAD * N_AGENTS, N_AGENTS), np.float32)    # head/kernel-sum per agent
    for h in range(N_HEAD):
        for a in range(N_AGENTS):
            r0 = h * N_AGENTS * UNIT_DIM + a * UNIT_DIM
            R[r0:r0 + UNIT_DIM, h * N_AGENTS + a] = 1.0
            Gsum[h * N_AGENTS + a, h] = 1.0
            Asum[h * N_AGENTS + a, a] = 1.0
    Gbc = np.ascontiguousarray(Gsum.T)                            # group broadcast (4, 32)

    # ---- final projection: [q | adv_term | lg^2 | p*log p] (80) -> [yv | yadv | lsq | ent] (10) ----
    Wout = np.zeros((FEAT_W, OUT_W), np.float32)
    Wout[0:N_AGENTS, 0] = 1.0
    Wout[N_AGENTS:2 * N_AGENTS, 1] = 1.0
    for h in range(N_HEAD):
        Wout[2 * N_AGENTS + h * N_AGENTS:
             2 * N_AGENTS + (h + 1) * N_AGENTS, 2 + h] = 1.0
        Wout[2 * N_AGENTS + N_HEAD * N_AGENTS + h * N_AGENTS:
             2 * N_AGENTS + N_HEAD * N_AGENTS + (h + 1) * N_AGENTS, 2 + N_HEAD + h] = 1.0

    return dict(
        W1=jnp.asarray(W1).astype(bf16), B1=jnp.asarray(B1),
        W2=jnp.asarray(W2).astype(bf16),
        R=jnp.asarray(R), Gsum=jnp.asarray(Gsum), Gbc=jnp.asarray(Gbc),
        Asum=jnp.asarray(Asum), Wout=jnp.asarray(Wout),
    )


# ------------------------------- wrapper (glue) -------------------------------
def _tpu_generation():
    try:
        kind = jax.devices()[0].device_kind.lower()
    except Exception:
        return 0
    for g in (7, 6, 5, 4):
        if "v%d" % g in kind:
            return g
    return 0


def _pick_tile(b, gen):
    if gen >= 7:
        # dual TensorCore: keep >= 2 grid steps so both cores get work; 64 MiB physical VMEM
        cap, min_steps, vmem = 1024, 2, 48 << 20
    elif gen in (5, 6):
        # single TensorCore, 128 MiB physical VMEM: one big tile, raise the scoped limit
        cap, min_steps, vmem = 2048, 1, 100 << 20
    elif gen == 4:
        cap, min_steps, vmem = 1024, 1, 64 << 20
    else:  # unknown backend: stay conservative, keep default scoped VMEM
        cap, min_steps, vmem = 256, 1, None
    tb = -(-b // min_steps)                  # ceil
    tb = ((tb + 7) // 8) * 8                 # sublane multiple
    tb = max(8, min(tb, cap))
    return tb, vmem


def qatten_mixer_forward(packed, agent_qs, states, actions, max_q_i, is_v=False):
    bs, t, _ = agent_qs.shape
    b = bs * t

    st = states.reshape(b, STATE_DIM).astype(f32)
    ac = actions.reshape(b, ACTION_DIM).astype(f32)
    aq = agent_qs.reshape(b, N_AGENTS).astype(f32)
    mq = (jnp.zeros((b, N_AGENTS), f32) if max_q_i is None
          else max_q_i.reshape(b, N_AGENTS).astype(f32))
    slab = jnp.concatenate([st, ac, aq, mq], axis=-1)          # (b, 128) lane-dense input

    gen = _tpu_generation()
    tb, vmem_limit = _pick_tile(b, gen)
    bp = ((b + tb - 1) // tb) * tb
    if bp != b:
        slab = jnp.pad(slab, ((0, bp - b), (0, 0)))
    grid = (bp // tb,)

    w_order = ["W1", "B1", "W2", "R", "Gsum", "Gbc", "Asum", "Wout"]
    w_arrays = [packed[n] for n in w_order]

    out = pl.pallas_call(
        qatten_mixer_kernel,
        out_shape=jax.ShapeDtypeStruct((bp, OUT_W), f32),
        grid_spec=pltpu.PrefetchScalarGridSpec(
            num_scalar_prefetch=0,
            grid=grid,
            in_specs=[pl.BlockSpec((tb, IN_W), lambda i: (i, 0))]
                     + [pl.BlockSpec(w.shape, lambda i: (0, 0)) for w in w_arrays],
            out_specs=pl.BlockSpec((tb, OUT_W), lambda i: (i, 0)),
        ),
        compiler_params=pltpu.CompilerParams(
            dimension_semantics=("parallel",),
            vmem_limit_bytes=vmem_limit),
    )(slab, *w_arrays)

    out = out[:b]
    yv, yadv = out[:, 0], out[:, 1]
    lsq = out[:, 2:2 + N_HEAD]
    ent = out[:, 2 + N_HEAD:2 + 2 * N_HEAD]

    # cheap scalar batch reductions in plain JAX
    attend_mag_regs = ATTEND_REG_COEF * (jnp.sum(lsq) / (b * N_AGENTS))
    head_entropies = [-jnp.mean(ent[:, h]) for h in range(N_HEAD)]

    y = yv if is_v else yadv
    return y.reshape(bs, t, 1), attend_mag_regs, head_entropies


# --------------------------- pure-JAX f32 reference ---------------------------
def reference_forward(params, agent_qs, states, actions, max_q_i, is_v=False):
    bs, t, _ = agent_qs.shape
    b = bs * t
    st = states.reshape(b, STATE_DIM).astype(f32)
    aq = agent_qs.reshape(b, N_AGENTS).astype(f32)
    ac = actions.reshape(b, ACTION_DIM).astype(f32)
    mq = max_q_i.reshape(b, N_AGENTS).astype(f32)
    unit = st[:, : N_AGENTS * UNIT_DIM].reshape(b, N_AGENTS, UNIT_DIM)

    hh = jax.nn.relu(st @ params["hwW1"] + params["hwB1"])
    w_head = jnp.abs(hh @ params["hwW2"] + params["hwB2"])
    hv = jax.nn.relu(st @ params["vW1"] + params["vB1"])
    v = hv @ params["vW2"] + params["vB2"]

    w_final = jnp.zeros((b, N_AGENTS), f32)
    logits_list, probs_list = [], []
    for h in range(N_HEAD):
        h1 = jax.nn.relu(st @ params["selW1"][h])
        sel = h1 @ params["selW2"][h]
        keys = jnp.einsum("bau,ue->bae", unit, params["keyW"][h])
        logits = jnp.einsum("be,bae->ba", sel, keys)
        probs = jax.nn.softmax(logits / np.sqrt(EMBED), axis=-1)
        w_final = w_final + probs * w_head[:, h:h + 1]
        logits_list.append(logits)
        probs_list.append(probs)

    attend_mag_regs = ATTEND_REG_COEF * sum(jnp.mean(l ** 2) for l in logits_list)
    head_entropies = [-jnp.mean(jnp.sum(p * jnp.log(p + 1e-8), axis=-1)) for p in probs_list]

    w_final = jnp.abs(w_final + 1e-10)
    v_rep = jnp.abs(jnp.broadcast_to(v, (b, N_AGENTS)) / N_AGENTS)
    q = w_final * aq + v_rep
    if is_v:
        y = jnp.sum(q, axis=-1)
    else:
        mqv = w_final * mq + v_rep
        adv_q = q - mqv
        sa = jnp.concatenate([st, ac], axis=-1)
        adv_w = jnp.zeros((b, N_AGENTS), f32)
        for k in range(NUM_KERNEL):
            key = jax.nn.relu(st @ params["kW1"][k] + params["kB1"][k]) @ params["kW2"][k] + params["kB2"][k]
            ag = jax.nn.relu(st @ params["aW1"][k] + params["aB1"][k]) @ params["aW2"][k] + params["aB2"][k]
            acn = jax.nn.relu(sa @ params["cW1"][k] + params["cB1"][k]) @ params["cW2"][k] + params["cB2"][k]
            adv_w = adv_w + (jnp.abs(key) + 1e-10) * jax.nn.sigmoid(ag) * jax.nn.sigmoid(acn)
        if IS_MINUS_ONE:
            y = jnp.sum(adv_q * (adv_w - 1.0), axis=-1)
        else:
            y = jnp.sum(adv_q * adv_w, axis=-1)
    return y.reshape(bs, t, 1), attend_mag_regs, head_entropies


# ------------------------------ parameter init -------------------------------
def init_params(key):
    shapes = {
        "selW1": (N_HEAD, STATE_DIM, EMBED),
        "selW2": (N_HEAD, EMBED, EMBED),
        "keyW": (N_HEAD, UNIT_DIM, EMBED),
        "hwW1": (STATE_DIM, EMBED), "hwB1": (1, EMBED),
        "hwW2": (EMBED, N_HEAD), "hwB2": (1, N_HEAD),
        "vW1": (STATE_DIM, EMBED), "vB1": (1, EMBED),
        "vW2": (EMBED, 1), "vB2": (1, 1),
        "kW1": (NUM_KERNEL, STATE_DIM, ADV_HYPER), "kB1": (NUM_KERNEL, 1, ADV_HYPER),
        "kW2": (NUM_KERNEL, ADV_HYPER, 1), "kB2": (NUM_KERNEL, 1, 1),
        "aW1": (NUM_KERNEL, STATE_DIM, ADV_HYPER), "aB1": (NUM_KERNEL, 1, ADV_HYPER),
        "aW2": (NUM_KERNEL, ADV_HYPER, N_AGENTS), "aB2": (NUM_KERNEL, 1, N_AGENTS),
        "cW1": (NUM_KERNEL, SA_DIM, ADV_HYPER), "cB1": (NUM_KERNEL, 1, ADV_HYPER),
        "cW2": (NUM_KERNEL, ADV_HYPER, N_AGENTS), "cB2": (NUM_KERNEL, 1, N_AGENTS),
    }
    params = {}
    keys = jax.random.split(key, len(shapes))
    for (name, shp), k in zip(shapes.items(), keys):
        params[name] = 0.1 * jax.random.normal(k, shp, dtype=f32)
    return params


# ------------------------------------ main ------------------------------------
if __name__ == "__main__":
    root = jax.random.PRNGKey(0)
    pk, k1, k2, k3, k4 = jax.random.split(root, 5)
    params = init_params(pk)
    packed = pack_params(params)

    agent_qs = jax.random.normal(k1, (BS, T, N_AGENTS), dtype=f32)
    states = jax.random.normal(k2, (BS, T, STATE_DIM), dtype=f32)
    act_idx = jax.random.randint(k3, (BS, T, N_AGENTS), 0, N_ACTIONS)
    actions = jax.nn.one_hot(act_idx, N_ACTIONS, dtype=f32)     # (BS, T, N_AGENTS, N_ACTIONS)
    max_q_i = jax.random.normal(k4, (BS, T, N_AGENTS), dtype=f32)

    v_tot, reg, ents = qatten_mixer_forward(packed, agent_qs, states, actions, max_q_i, is_v=False)
    jax.block_until_ready(v_tot)
    jax.block_until_ready(reg)

    v_ref, reg_ref, ents_ref = reference_forward(params, agent_qs, states, actions, max_q_i, is_v=False)

    # bf16 matmul operands in the kernel vs f32 reference -> loosened tolerances
    np.testing.assert_allclose(np.asarray(v_tot), np.asarray(v_ref), rtol=5e-2, atol=5e-2)
    np.testing.assert_allclose(float(reg), float(reg_ref), rtol=5e-2, atol=1e-4)
    for a_, b_ in zip(ents, ents_ref):
        np.testing.assert_allclose(float(a_), float(b_), rtol=5e-2, atol=5e-2)

    print("KERNEL_OK")
</pallas_src>

<mosaic_0001>
module attributes {stable_mosaic.version = 11 : i64} {
  func.func @qatten_mixer_kernel(%arg0: i32, %arg1: memref<16x128xf32, #tpu.memory_space<vmem>>, %arg2: memref<128x1024xbf16, #tpu.memory_space<vmem>>, %arg3: memref<1x1024xf32, #tpu.memory_space<vmem>>, %arg4: memref<1024x384xbf16, #tpu.memory_space<vmem>>, %arg5: memref<256x32xf32, #tpu.memory_space<vmem>>, %arg6: memref<32x4xf32, #tpu.memory_space<vmem>>, %arg7: memref<4x32xf32, #tpu.memory_space<vmem>>, %arg8: memref<32x8xf32, #tpu.memory_space<vmem>>, %arg9: memref<80x10xf32, #tpu.memory_space<vmem>>, %arg10: memref<16x10xf32, #tpu.memory_space<vmem>>) attributes {dimension_semantics = [#tpu.dimension_semantics<parallel>], iteration_bounds = array<i64: 1>, scalar_prefetch = 0 : i64, scratch_operands = 0 : i64, tpu.core_type = #tpu.core_type<tc>, window_params = [{transform_indices = @transform_0, window_bounds = array<i64: 16, 128>}, {pipeline_mode = #tpu.pipeline_mode<synchronous>, transform_indices = @transform_1, window_bounds = array<i64: 128, 1024>}, {pipeline_mode = #tpu.pipeline_mode<synchronous>, transform_indices = @transform_2, window_bounds = array<i64: 1, 1024>}, {pipeline_mode = #tpu.pipeline_mode<synchronous>, transform_indices = @transform_3, window_bounds = array<i64: 1024, 384>}, {pipeline_mode = #tpu.pipeline_mode<synchronous>, transform_indices = @transform_4, window_bounds = array<i64: 256, 32>}, {pipeline_mode = #tpu.pipeline_mode<synchronous>, transform_indices = @transform_5, window_bounds = array<i64: 32, 4>}, {pipeline_mode = #tpu.pipeline_mode<synchronous>, transform_indices = @transform_6, window_bounds = array<i64: 4, 32>}, {pipeline_mode = #tpu.pipeline_mode<synchronous>, transform_indices = @transform_7, window_bounds = array<i64: 32, 8>}, {pipeline_mode = #tpu.pipeline_mode<synchronous>, transform_indices = @transform_8, window_bounds = array<i64: 80, 10>}, {transform_indices = @transform_9, window_bounds = array<i64: 16, 10>}]} {
    %c0 = arith.constant 0 : index
    %c0_0 = arith.constant 0 : index
    %0 = vector.load %arg1[%c0, %c0_0] : memref<16x128xf32, #tpu.memory_space<vmem>>, vector<16x128xf32>
    %1 = vector.extract_strided_slice %0 {offsets = [0, 0], sizes = [16, 64], strides = [1, 1]} : vector<16x128xf32> to vector<16x64xf32>
    %2 = vector.extract_strided_slice %0 {offsets = [0, 112], sizes = [16, 8], strides = [1, 1]} : vector<16x128xf32> to vector<16x8xf32>
    %3 = vector.extract_strided_slice %0 {offsets = [0, 120], sizes = [16, 8], strides = [1, 1]} : vector<16x128xf32> to vector<16x8xf32>
    %4 = arith.truncf %0 : vector<16x128xf32> to vector<16x128xbf16>
    %c0_1 = arith.constant 0 : index
    %c0_2 = arith.constant 0 : index
    %5 = vector.load %arg2[%c0_1, %c0_2] : memref<128x1024xbf16, #tpu.memory_space<vmem>>, vector<128x1024xbf16>
    %cst = arith.constant dense<0.000000e+00> : vector<16x1024xf32>
    %6 = tpu.matmul %4, %5, %cst {dimension_numbers = #tpu.dot_dimension_numbers<[1], [0], [0], [1], [0, 0, 1, 1], [], []>} : vector<16x128xbf16>, vector<128x1024xbf16>, vector<16x1024xf32> -> vector<16x1024xf32>
    %c0_3 = arith.constant 0 : index
    %c0_4 = arith.constant 0 : index
    %7 = vector.load %arg3[%c0_3, %c0_4] : memref<1x1024xf32, #tpu.memory_space<vmem>>, vector<1x1024xf32>
    %8 = vector.broadcast %7 : vector<1x1024xf32> to vector<16x1024xf32>
    %9 = arith.addf %6, %8 : vector<16x1024xf32>
    %cst_5 = arith.constant 0.000000e+00 : f32
    %10 = vector.broadcast %cst_5 : f32 to vector<16x1024xf32>
    %11 = arith.maximumf %9, %10 : vector<16x1024xf32>
    %12 = arith.truncf %11 : vector<16x1024xf32> to vector<16x1024xbf16>
    %c0_6 = arith.constant 0 : index
    %c0_7 = arith.constant 0 : index
    %13 = vector.load %arg4[%c0_6, %c0_7] : memref<1024x384xbf16, #tpu.memory_space<vmem>>, vector<1024x384xbf16>
    %cst_8 = arith.constant dense<0.000000e+00> : vector<16x384xf32>
    %14 = tpu.matmul %12, %13, %cst_8 {dimension_numbers = #tpu.dot_dimension_numbers<[1], [0], [0], [1], [0, 0, 1, 1], [], []>} : vector<16x1024xbf16>, vector<1024x384xbf16>, vector<16x384xf32> -> vector<16x384xf32>
    %15 = vector.extract_strided_slice %14 {offsets = [0, 0], sizes = [16, 256], strides = [1, 1]} : vector<16x384xf32> to vector<16x256xf32>
    %16 = vector.extract_strided_slice %14 {offsets = [0, 256], sizes = [16, 128], strides = [1, 1]} : vector<16x384xf32> to vector<16x128xf32>
    %17 = vector.extract_strided_slice %16 {offsets = [0, 0], sizes = [16, 4], strides = [1, 1]} : vector<16x128xf32> to vector<16x4xf32>
    %18 = math.absf %17 : vector<16x4xf32>
    %cst_9 = arith.constant 1.000000e-10 : f32
    %19 = vector.broadcast %cst_9 : f32 to vector<16x4xf32>
    %20 = arith.addf %18, %19 : vector<16x4xf32>
    %21 = vector.extract_strided_slice %16 {offsets = [0, 4], sizes = [16, 64], strides = [1, 1]} : vector<16x128xf32> to vector<16x64xf32>
    %22 = arith.negf %21 : vector<16x64xf32>
    %23 = math.exp %22 : vector<16x64xf32>
    %cst_10 = arith.constant 1.000000e+00 : f32
    %24 = vector.broadcast %cst_10 : f32 to vector<16x64xf32>
    %25 = arith.addf %24, %23 : vector<16x64xf32>
    %26 = arith.divf %24, %25 : vector<16x64xf32>
    %27 = vector.extract_strided_slice %26 {offsets = [0, 0], sizes = [16, 32], strides = [1, 1]} : vector<16x64xf32> to vector<16x32xf32>
    %28 = vector.extract_strided_slice %26 {offsets = [0, 32], sizes = [16, 32], strides = [1, 1]} : vector<16x64xf32> to vector<16x32xf32>
    %29 = vector.extract_strided_slice %16 {offsets = [0, 68], sizes = [16, 4], strides = [1, 1]} : vector<16x128xf32> to vector<16x4xf32>
    %30 = math.absf %29 : vector<16x4xf32>
    %31 = vector.extract_strided_slice %16 {offsets = [0, 72], sizes = [16, 1], strides = [1, 1]} : vector<16x128xf32> to vector<16x1xf32>
    %32 = tpu.concatenate %1, %1, %1, %1 in 1 : vector<16x64xf32>, vector<16x64xf32>, vector<16x64xf32>, vector<16x64xf32> -> vector<16x256xf32>
    %33 = arith.mulf %32, %15 : vector<16x256xf32>
    %c0_11 = arith.constant 0 : index
    %c0_12 = arith.constant 0 : index
    %34 = vector.load %arg5[%c0_11, %c0_12] : memref<256x32xf32, #tpu.memory_space<vmem>>, vector<256x32xf32>
    %cst_13 = arith.constant dense<0.000000e+00> : vector<16x32xf32>
    %35 = tpu.matmul %33, %34, %cst_13 {dimension_numbers = #tpu.dot_dimension_numbers<[1], [0], [0], [1], [0, 0, 1, 1], [], []>} : vector<16x256xf32>, vector<256x32xf32>, vector<16x32xf32> -> vector<16x32xf32>
    %cst_14 = arith.constant 0.176776692 : f32
    %36 = vector.broadcast %cst_14 : f32 to vector<16x32xf32>
    %37 = arith.mulf %35, %36 : vector<16x32xf32>
    %cst_15 = arith.constant dense<0xFF800000> : vector<16xf32>
    %38 = vector.multi_reduction <maximumf>, %37, %cst_15 [1] : vector<16x32xf32> to vector<16xf32>
    %39 = vector.shape_cast %38 : vector<16xf32> to vector<16x1xf32>
    %40 = vector.broadcast %39 : vector<16x1xf32> to vector<16x32xf32>
    %41 = arith.subf %37, %40 : vector<16x32xf32>
    %42 = math.exp %41 : vector<16x32xf32>
    %c0_16 = arith.constant 0 : index
    %c0_17 = arith.constant 0 : index
    %43 = vector.load %arg6[%c0_16, %c0_17] : memref<32x4xf32, #tpu.memory_space<vmem>>, vector<32x4xf32>
    %cst_18 = arith.constant dense<0.000000e+00> : vector<16x4xf32>
    %44 = tpu.matmul %42, %43, %cst_18 {dimension_numbers = #tpu.dot_dimension_numbers<[1], [0], [0], [1], [0, 0, 1, 1], [], []>} : vector<16x32xf32>, vector<32x4xf32>, vector<16x4xf32> -> vector<16x4xf32>
    %45 = tpu.reciprocal %44 {approx = true} : vector<16x4xf32> -> vector<16x4xf32>
    %c0_19 = arith.constant 0 : index
    %c0_20 = arith.constant 0 : index
    %46 = vector.load %arg7[%c0_19, %c0_20] : memref<4x32xf32, #tpu.memory_space<vmem>>, vector<4x32xf32>
    %cst_21 = arith.constant dense<0.000000e+00> : vector<16x32xf32>
    %47 = tpu.matmul %45, %46, %cst_21 {dimension_numbers = #tpu.dot_dimension_numbers<[1], [0], [0], [1], [0, 0, 1, 1], [], []>} : vector<16x4xf32>, vector<4x32xf32>, vector<16x32xf32> -> vector<16x32xf32>
    %48 = arith.mulf %42, %47 : vector<16x32xf32>
    %cst_22 = arith.constant 9.99999993E-9 : f32
    %49 = vector.broadcast %cst_22 : f32 to vector<16x32xf32>
    %50 = arith.addf %48, %49 : vector<16x32xf32>
    %51 = math.log %50 : vector<16x32xf32>
    %52 = arith.mulf %48, %51 : vector<16x32xf32>
    %c0_23 = arith.constant 0 : index
    %c0_24 = arith.constant 0 : index
    %53 = vector.load %arg7[%c0_23, %c0_24] : memref<4x32xf32, #tpu.memory_space<vmem>>, vector<4x32xf32>
    %cst_25 = arith.constant dense<0.000000e+00> : vector<16x32xf32>
    %54 = tpu.matmul %30, %53, %cst_25 {dimension_numbers = #tpu.dot_dimension_numbers<[1], [0], [0], [1], [0, 0, 1, 1], [], []>} : vector<16x4xf32>, vector<4x32xf32>, vector<16x32xf32> -> vector<16x32xf32>
    %55 = arith.mulf %48, %54 : vector<16x32xf32>
    %c0_26 = arith.constant 0 : index
    %c0_27 = arith.constant 0 : index
    %56 = vector.load %arg8[%c0_26, %c0_27] : memref<32x8xf32, #tpu.memory_space<vmem>>, vector<32x8xf32>
    %cst_28 = arith.constant dense<0.000000e+00> : vector<16x8xf32>
    %57 = tpu.matmul %55, %56, %cst_28 {dimension_numbers = #tpu.dot_dimension_numbers<[1], [0], [0], [1], [0, 0, 1, 1], [], []>} : vector<16x32xf32>, vector<32x8xf32>, vector<16x8xf32> -> vector<16x8xf32>
    %cst_29 = arith.constant 1.000000e-10 : f32
    %58 = vector.broadcast %cst_29 : f32 to vector<16x8xf32>
    %59 = arith.addf %57, %58 : vector<16x8xf32>
    %60 = math.absf %59 : vector<16x8xf32>
    %61 = math.absf %31 : vector<16x1xf32>
    %cst_30 = arith.constant 1.250000e-01 : f32
    %62 = vector.broadcast %cst_30 : f32 to vector<16x1xf32>
    %63 = arith.mulf %61, %62 : vector<16x1xf32>
    %64 = arith.mulf %60, %2 : vector<16x8xf32>
    %65 = vector.broadcast %63 : vector<16x1xf32> to vector<16x8xf32>
    %66 = arith.addf %64, %65 : vector<16x8xf32>
    %67 = arith.subf %2, %3 : vector<16x8xf32>
    %68 = arith.mulf %60, %67 : vector<16x8xf32>
    %c0_31 = arith.constant 0 : index
    %c0_32 = arith.constant 0 : index
    %69 = vector.load %arg7[%c0_31, %c0_32] : memref<4x32xf32, #tpu.memory_space<vmem>>, vector<4x32xf32>
    %cst_33 = arith.constant dense<0.000000e+00> : vector<16x32xf32>
    %70 = tpu.matmul %20, %69, %cst_33 {dimension_numbers = #tpu.dot_dimension_numbers<[1], [0], [0], [1], [0, 0, 1, 1], [], []>} : vector<16x4xf32>, vector<4x32xf32>, vector<16x32xf32> -> vector<16x32xf32>
    %71 = arith.mulf %70, %27 : vector<16x32xf32>
    %72 = arith.mulf %71, %28 : vector<16x32xf32>
    %c0_34 = arith.constant 0 : index
    %c0_35 = arith.constant 0 : index
    %73 = vector.load %arg8[%c0_34, %c0_35] : memref<32x8xf32, #tpu.memory_space<vmem>>, vector<32x8xf32>
    %cst_36 = arith.constant dense<0.000000e+00> : vector<16x8xf32>
    %74 = tpu.matmul %72, %73, %cst_36 {dimension_numbers = #tpu.dot_dimension_numbers<[1], [0], [0], [1], [0, 0, 1, 1], [], []>} : vector<16x32xf32>, vector<32x8xf32>, vector<16x8xf32> -> vector<16x8xf32>
    %cst_37 = arith.constant 1.000000e+00 : f32
    %75 = vector.broadcast %cst_37 : f32 to vector<16x8xf32>
    %76 = arith.subf %74, %75 : vector<16x8xf32>
    %77 = arith.mulf %68, %76 : vector<16x8xf32>
    %78 = arith.mulf %35, %35 : vector<16x32xf32>
    %79 = tpu.concatenate %66, %77, %78, %52 in 1 : vector<16x8xf32>, vector<16x8xf32>, vector<16x32xf32>, vector<16x32xf32> -> vector<16x80xf32>
    %c0_38 = arith.constant 0 : index
    %c0_39 = arith.constant 0 : index
    %80 = vector.load %arg9[%c0_38, %c0_39] : memref<80x10xf32, #tpu.memory_space<vmem>>, vector<80x10xf32>
    %cst_40 = arith.constant dense<0.000000e+00> : vector<16x10xf32>
    %81 = tpu.matmul %79, %80, %cst_40 {dimension_numbers = #tpu.dot_dimension_numbers<[1], [0], [0], [1], [0, 0, 1, 1], [], []>} : vector<16x80xf32>, vector<80x10xf32>, vector<16x10xf32> -> vector<16x10xf32>
    %c0_41 = arith.constant 0 : index
    %c0_42 = arith.constant 0 : index
    %82 = vector.load %arg10[%c0_41, %c0_42] : memref<16x10xf32, #tpu.memory_space<vmem>>, vector<16x10xf32>
    tpu.vector_store %arg10[%c0_41, %c0_42], %81 {strides = array<i32>} : memref<16x10xf32, #tpu.memory_space<vmem>>, vector<16x10xf32>,
    return
  }
  func.func @transform_0(%arg0: i32) -> (i32, i32) {
    %c0_i32 = arith.constant 0 : i32
    %c0_i32_0 = arith.constant 0 : i32
    return %arg0, %c0_i32 : i32, i32
  }
  func.func @transform_1(%arg0: i32) -> (i32, i32) {
    %c0_i32 = arith.constant 0 : i32
    %c0_i32_0 = arith.constant 0 : i32
    %c0_i32_1 = arith.constant 0 : i32
    return %c0_i32, %c0_i32_0 : i32, i32
  }
  func.func @transform_2(%arg0: i32) -> (i32, i32) {
    %c0_i32 = arith.constant 0 : i32
    %c0_i32_0 = arith.constant 0 : i32
    %c0_i32_1 = arith.constant 0 : i32
    return %c0_i32, %c0_i32_0 : i32, i32
  }
  func.func @transform_3(%arg0: i32) -> (i32, i32) {
    %c0_i32 = arith.constant 0 : i32
    %c0_i32_0 = arith.constant 0 : i32
    %c0_i32_1 = arith.constant 0 : i32
    return %c0_i32, %c0_i32_0 : i32, i32
  }
  func.func @transform_4(%arg0: i32) -> (i32, i32) {
    %c0_i32 = arith.constant 0 : i32
    %c0_i32_0 = arith.constant 0 : i32
    %c0_i32_1 = arith.constant 0 : i32
    return %c0_i32, %c0_i32_0 : i32, i32
  }
  func.func @transform_5(%arg0: i32) -> (i32, i32) {
    %c0_i32 = arith.constant 0 : i32
    %c0_i32_0 = arith.constant 0 : i32
    %c0_i32_1 = arith.constant 0 : i32
    return %c0_i32, %c0_i32_0 : i32, i32
  }
  func.func @transform_6(%arg0: i32) -> (i32, i32) {
    %c0_i32 = arith.constant 0 : i32
    %c0_i32_0 = arith.constant 0 : i32
    %c0_i32_1 = arith.constant 0 : i32
    return %c0_i32, %c0_i32_0 : i32, i32
  }
  func.func @transform_7(%arg0: i32) -> (i32, i32) {
    %c0_i32 = arith.constant 0 : i32
    %c0_i32_0 = arith.constant 0 : i32
    %c0_i32_1 = arith.constant 0 : i32
    return %c0_i32, %c0_i32_0 : i32, i32
  }
  func.func @transform_8(%arg0: i32) -> (i32, i32) {
    %c0_i32 = arith.constant 0 : i32
    %c0_i32_0 = arith.constant 0 : i32
    %c0_i32_1 = arith.constant 0 : i32
    return %c0_i32, %c0_i32_0 : i32, i32
  }
  func.func @transform_9(%arg0: i32) -> (i32, i32) {
    %c0_i32 = arith.constant 0 : i32
    %c0_i32_0 = arith.constant 0 : i32
    return %arg0, %c0_i32 : i32, i32
  }
}

</mosaic_0001>

<bundles_post_ra>
// kernel: tpu_custom_call.1
= control target key start
LH: loop header
LB: loop body
LE: loop exit
PB: predicated region body
PF: predicated region fallthrough
CT: control target
= control target key end

     0   :  { %14 = vsyncpa [#allocation3], 0  ;;  %s4561_s0 = inlined_call_operand.vmem [shape: f32[16,128], index: 0, kind: input, shape index: {}]   ;;  %s4562_s1 = inlined_call_operand.hbm [shape: bf16[128,1024], index: 1, kind: input, shape index: {}]   ;;  %s4563_s2 = inlined_call_operand.vmem [shape: f32[1,1024], index: 2, kind: input, shape index: {}]   ;;  %s4564_s3 = inlined_call_operand.hbm [shape: bf16[1024,384], index: 3, kind: input, shape index: {}]   ;;  %s4565_s4 = inlined_call_operand.vmem [shape: f32[256,32], index: 4, kind: input, shape index: {}]   ;;  %s4566_s5 = inlined_call_operand.vmem [shape: f32[32,4], index: 5, kind: input, shape index: {}]   ;;  %s4567_s6 = inlined_call_operand.vmem [shape: f32[4,32], index: 6, kind: input, shape index: {}]   ;;  %s4568_s7 = inlined_call_operand.vmem [shape: f32[32,8], index: 7, kind: input, shape index: {}]   ;;  %s4569_s8 = inlined_call_operand.vmem [shape: f32[80,10], index: 8, kind: input, shape index: {}]   ;;  %s4570_s9 = inlined_call_operand.hbm [shape: f32[16,10], index: 9, kind: output, shape index: {}]  }
   0x1   :  { %15 = vsyncpa [#allocation6], 0 }
   0x2   :  { %16 = vsyncpa [#allocation4], 0  ;;  %s4157_s30 = smov [#allocation2]   ;;  %s4085_s13 = scalar_lea.hbm %s4562_s1, 8192 }
   0x3   :  { %s24_s10 = sshll.u32 %s4157_s30, 4  ;;  %p4086_p0 = scmp.ne.s32.totalorder %s4562_s1, %s4085_s13  ;;  %s25_s10 = int_to_ptr.vmem [resolvable:$true] %s24_s10 }
   0x4   :  { %p4089_p1 = scmp.lt.u32.totalorder %s4085_s13, %s4562_s1 }
   0x6   :  { %p4091_p2 = pnand %p4089_p1, %p4086_p0 }
   0x8   :  { %4094 = shalt.err (!%p4091_p2)
}
   0x9   :  { %s4095_s18 = scalar_lea.vmem %s25_s10, 8192  ;;  %p4100_p4 = scmp.lt.s32.totalorder %s25_s10, %s25_s10 }
   0xa   :  { %p4096_p3 = scmp.ne.s32.totalorder %s25_s10, %s4095_s18  ;;  %p4101_p5 = scmp.lt.s32.totalorder %s4095_s18, %s4095_s18 }
   0xc   :  { %p4102_p6 = por %p4101_p5, %p4100_p4 }
   0xe   :  { %p4103_p7 = pnand %p4102_p6, %p4096_p3 }
  0x10   :  { %4106 = shalt.err (!%p4103_p7)
}
  0x11   :  { %s4158_s19 = smov 512   ;;  %s4159_s20 = smov 32  }
  0x12   :  { %30 = dma.hbm_to_vmem [thread:$0]  %s4562_s1, 8192, %s25_s10, [#allocation3], %s4158_s19, %s4158_s19, %s4159_s20  }
  0x13   :  { %s4160_s23 = smov [#allocation5]   ;;  %s4107_s27 = scalar_lea.hbm %s4564_s3, 24576 }
  0x14   :  { %s38_s24 = sshll.u32 %s4160_s23, 4  ;;  %p4108_p8 = scmp.ne.s32.totalorder %s4564_s3, %s4107_s27  ;;  %s39_s24 = int_to_ptr.vmem [resolvable:$true] %s38_s24 }
  0x15   :  { %p4111_p9 = scmp.lt.u32.totalorder %s4107_s27, %s4564_s3 }
  0x17   :  { %p4113_p10 = pnand %p4111_p9, %p4108_p8 }
  0x19   :  { %4116 = shalt.err (!%p4113_p10)
}
  0x1a   :  { %s4117_s12 = scalar_lea.vmem %s39_s24, 24576  ;;  %p4122_p12 = scmp.lt.s32.totalorder %s39_s24, %s39_s24 }
  0x1b   :  { %p4118_p11 = scmp.ne.s32.totalorder %s39_s24, %s4117_s12  ;;  %p4123_p13 = scmp.lt.s32.totalorder %s4117_s12, %s4117_s12 }
  0x1d   :  { %p4124_p0 = por %p4123_p13, %p4122_p12 }
  0x1f   :  { %p4125_p1 = pnand %p4124_p0, %p4118_p11 }
  0x21   :  { %4128 = shalt.err (!%p4125_p1)
}
  0x22   :  { %s4161_s1 = smov 192   ;;  %s4162_s10 = smov 12  }
  0x23   :  { %44 = dma.hbm_to_vmem [thread:$0]  %s4564_s3, 24576, %s39_s24, [#allocation6], %s4161_s1, %s4161_s1, %s4162_s10  }
  0x24   :  { %4151 = dma.done.wait [#allocation3], 8192  }
  0x25   :  { %4152 = vsyncadd [#allocation3], 4294959104 }
  0x26   :  { %4153 = dma.done.wait [#allocation6], 24576  }
  0x27   :  { %4154 = vsyncadd [#allocation6], 4294942720  ;;  %v4163_v0 = vmov 0   ;;  %v65_v1 = vld [vmem:[#allocation2] sm:$0xff]  ;;  %v67_v18 = vld [vmem:[#allocation2 + $0x10] sm:$0xff]  ;;  %s4164_s21 = smov 64  }
  0x28   :  { %523 = vmatprep.mubr.bf16.mxu1 %v4163_v0  ;;  %609 = vmatprep.mubr.bf16.mxu0 %v4163_v0  ;;  %v69_v2 = vld [vmem:[#allocation2 + $0x20] sm:$0xff]  ;;  %v71_v19 = vld [vmem:[#allocation2 + $0x30] sm:$0xff]  ;;  %v66_v49 = vld [vmem:[#allocation2 + $0x8] sm:$0xff]  ;;  %s4166_s3 = smov 124   ;;  %s4168_s15 = smov 92   ;;  %vm2327_vm0 = vcmask 523264  }
  0x29   :  { %v73_v3 = vld [vmem:[#allocation2 + $0x40] sm:$0xff]  ;;  %v3187_v4 = vcombine.high %v65_v1, %v69_v2  ;;  %v3186_v5 = vcombine.low %v65_v1, %v69_v2  ;;  %v3191_v21 = vcombine.high %v67_v18, %v71_v19  ;;  %v3190_v22 = vcombine.low %v67_v18, %v71_v19  ;;  %v75_v23 = vld [vmem:[#allocation2 + $0x50] sm:$0xff]  ;;  %v70_v54 = vld [vmem:[#allocation2 + $0x28] sm:$0xff]  ;;  %s4169_s16 = smov 120   ;;  %s4170_s17 = smov 16  }
  0x2a   :  { %v77_v6 = vld [vmem:[#allocation2 + $0x60] sm:$0xff]  ;;  %v79_v24 = vld [vmem:[#allocation2 + $0x70] sm:$0xff]  ;;  %v63_v58 = vld [vmem:[%s4561_s0 + $0x8] sm:$0xff]  ;;  %v3189_v61 = vcombine.high %v66_v49, %v70_v54  ;;  %vm2443_vm1 = vcmask 261120   ;;  %vm2551_vm2 = vcmask 1043456   ;;  %vm2544_vm3 = vcmask 31744  }
  0x2b   :  { %v3195_v7 = vcombine.high %v73_v3, %v77_v6  ;;  %v81_v8 = vld [vmem:[#allocation2 + $0x80] sm:$0xff]  ;;  %491 = vmatprep.subr.bf16.mxu1 %v3187_v4  ;;  %v3194_v10 = vcombine.low %v73_v3, %v77_v6  ;;  %v3199_v26 = vcombine.high %v75_v23, %v79_v24  ;;  %v83_v27 = vld [vmem:[#allocation2 + $0x90] sm:$0xff]  ;;  %577 = vmatprep.subr.bf16.mxu0 %v3191_v21  ;;  %v74_v59 = vld [vmem:[#allocation2 + $0x48] sm:$0xff]  ;;  %s4172_s24 = smov 48   ;;  %vm3064_vm4 = vcmask 64512  }
  0x2c   :  { %v85_v9 = vld [vmem:[#allocation2 + $0xa0] sm:$0xff]  ;;  %492 = vmatpush1.bf16.msra.mxu1 %v3186_v5  ;;  %v87_v28 = vld [vmem:[#allocation2 + $0xb0] sm:$0xff]  ;;  %578 = vmatpush1.bf16.msra.mxu0 %v3190_v22  ;;  %v3198_v31 = vcombine.low %v75_v23, %v79_v24  ;;  %v78_v62 = vld [vmem:[#allocation2 + $0x68] sm:$0xff]  ;;  %v3188_v4 = vcombine.low %v66_v49, %v70_v54  ;;  %vm3067_vm5 = vcmask 130048   ;;  %vm3070_vm6 = vcmask 392192  }
  0x2d   :  { %493 = vmatprep.subr.bf16.mxu1 %v3195_v7  ;;  %v3203_v11 = vcombine.high %v81_v8, %v85_v9  ;;  %v89_v12 = vld [vmem:[#allocation2 + $0xc0] sm:$0xff]  ;;  %v3202_v14 = vcombine.low %v81_v8, %v85_v9  ;;  %579 = vmatprep.subr.bf16.mxu0 %v3199_v26  ;;  %v3207_v33 = vcombine.high %v83_v27, %v87_v28  ;;  %v91_v35 = vld [vmem:[#allocation2 + $0xd0] sm:$0xff]  ;;  %v82_v5 = vld [vmem:[#allocation2 + $0x88] sm:$0xff]  ;;  %vm3083_vm7 = vcmask 654336  }
  0x2e   :  { %v93_v13 = vld [vmem:[#allocation2 + $0xe0] sm:$0xff]  ;;  %v95_v36 = vld [vmem:[#allocation2 + $0xf0] sm:$0xff]  ;;  %v3206_v39 = vcombine.low %v83_v27, %v87_v28  ;;  %v3197_v6 = vcombine.high %v74_v59, %v78_v62  ;;  %v98_v21 = vld [vmem:[#allocation2 + $0x108] sm:$0xff]  ;;  %vm3165_vm8 = vcmask 80896  }
  0x2f   :  { %v3211_v15 = vcombine.high %v89_v12, %v93_v13  ;;  %v97_v16 = vld [vmem:[#allocation2 + $0x100] sm:$0xff]  ;;  %v3210_v20 = vcombine.low %v89_v12, %v93_v13  ;;  %v3215_v41 = vcombine.high %v91_v35, %v95_v36  ;;  %v99_v44 = vld [vmem:[#allocation2 + $0x110] sm:$0xff]  ;;  %v3214_v47 = vcombine.low %v91_v35, %v95_v36  ;;  %v102_v22 = vld [vmem:[#allocation2 + $0x128] sm:$0xff] }
  0x30   :  { %494 = vmatpush1.bf16.msra.mxu1 %v3194_v10  ;;  %v101_v17 = vld [vmem:[#allocation2 + $0x120] sm:$0xff]  ;;  %580 = vmatpush1.bf16.msra.mxu0 %v3198_v31  ;;  %v103_v45 = vld [vmem:[#allocation2 + $0x130] sm:$0xff]  ;;  %v86_v10 = vld [vmem:[#allocation2 + $0xa8] sm:$0xff]  ;;  %v3196_v12 = vcombine.low %v74_v59, %v78_v62  ;;  %v3221_v26 = vcombine.high %v98_v21, %v102_v22 }
  0x31   :  { %495 = vmatprep.subr.bf16.mxu1 %v3203_v11  ;;  %v3219_v25 = vcombine.high %v97_v16, %v101_v17  ;;  %v105_v29 = vld [vmem:[#allocation2 + $0x140] sm:$0xff]  ;;  %v3218_v32 = vcombine.low %v97_v16, %v101_v17  ;;  %581 = vmatprep.subr.bf16.mxu0 %v3207_v33  ;;  %v3223_v50 = vcombine.high %v99_v44, %v103_v45  ;;  %v107_v52 = vld [vmem:[#allocation2 + $0x150] sm:$0xff]  ;;  %v94_v16 = vld [vmem:[#allocation2 + $0xe8] sm:$0xff] }
  0x32   :  { %v109_v30 = vld [vmem:[#allocation2 + $0x160] sm:$0xff]  ;;  %v111_v53 = vld [vmem:[#allocation2 + $0x170] sm:$0xff]  ;;  %v3222_v56 = vcombine.low %v99_v44, %v103_v45  ;;  %v3204_v18 = vcombine.low %v82_v5, %v86_v10  ;;  %v106_v27 = vld [vmem:[#allocation2 + $0x148] sm:$0xff] }
  0x33   :  { %v3227_v34 = vcombine.high %v105_v29, %v109_v30  ;;  %v113_v37 = vld [vmem:[#allocation2 + $0x180] sm:$0xff]  ;;  %v3226_v40 = vcombine.low %v105_v29, %v109_v30  ;;  %v3231_v60 = vcombine.high %v107_v52, %v111_v53  ;;  %v115_v63 = vld [vmem:[#allocation2 + $0x190] sm:$0xff]  ;;  %v3230_v3 = vcombine.low %v107_v52, %v111_v53  ;;  %v110_v28 = vld [vmem:[#allocation2 + $0x168] sm:$0xff] }
  0x34   :  { %496 = vmatpush1.bf16.msra.mxu1 %v3202_v14  ;;  %v117_v38 = vld [vmem:[#allocation2 + $0x1a0] sm:$0xff]  ;;  %582 = vmatpush1.bf16.msra.mxu0 %v3206_v39  ;;  %v119_v1 = vld [vmem:[#allocation2 + $0x1b0] sm:$0xff]  ;;  %v3205_v14 = vcombine.high %v82_v5, %v86_v10  ;;  %v3220_v30 = vcombine.low %v98_v21, %v102_v22  ;;  %v114_v33 = vld [vmem:[#allocation2 + $0x188] sm:$0xff]  ;;  %v3228_v36 = vcombine.low %v106_v27, %v110_v28 }
  0x35   :  { %497 = vmatprep.subr.bf16.mxu1 %v3211_v15  ;;  %v3235_v42 = vcombine.high %v113_v37, %v117_v38  ;;  %v121_v43 = vld [vmem:[#allocation2 + $0x1c0] sm:$0xff]  ;;  %v3234_v48 = vcombine.low %v113_v37, %v117_v38  ;;  %583 = vmatprep.subr.bf16.mxu0 %v3215_v41  ;;  %v3239_v7 = vcombine.high %v115_v63, %v119_v1  ;;  %v123_v8 = vld [vmem:[#allocation2 + $0x1d0] sm:$0xff]  ;;  %v90_v15 = vld [vmem:[#allocation2 + $0xc8] sm:$0xff] }
  0x36   :  { %v125_v46 = vld [vmem:[#allocation2 + $0x1e0] sm:$0xff]  ;;  %v127_v9 = vld [vmem:[#allocation2 + $0x1f0] sm:$0xff]  ;;  %v3238_v11 = vcombine.low %v115_v63, %v119_v1  ;;  %v3212_v24 = vcombine.low %v90_v15, %v94_v16  ;;  %v122_v37 = vld [vmem:[#allocation2 + $0x1c8] sm:$0xff] }
  0x37   :  { %v3243_v51 = vcombine.high %v121_v43, %v125_v46  ;;  %v62_v55 = vld [vmem:[%s4561_s0] sm:$0xff]  ;;  %v3242_v57 = vcombine.low %v121_v43, %v125_v46  ;;  %v3247_v13 = vcombine.high %v123_v8, %v127_v9  ;;  %v3246_v17 = vcombine.low %v123_v8, %v127_v9  ;;  %v3813_v35 = vld [vmem:[#allocation5 + $0x30] ss:$12 sps:$4 sm:$0xff]   ;;  %v126_v38 = vld [vmem:[#allocation2 + $0x1e8] sm:$0xff] }
  0x38   :  { %498 = vmatpush1.bf16.msra.mxu1 %v3210_v20  ;;  %584 = vmatpush1.bf16.msra.mxu0 %v3214_v47  ;;  %v4257_v2 = vpack.c.bf16 %v63_v58, %v62_v55  ;;  %v3809_v19 = vld [vmem:[#allocation5 + $0x4] ss:$12 sps:$4 sm:$0xff]   ;;  %v3213_v20 = vcombine.high %v90_v15, %v94_v16  ;;  %v3807_v23 = vld [vmem:[#allocation5] ss:$12 sps:$4 sm:$0xff]   ;;  %v3816_v41 = vld [vmem:[#allocation5 + $0x48] ss:$12 sps:$4 sm:$0xff]   ;;  %v3245_v46 = vcombine.high %v122_v37, %v126_v38 }
  0x39   :  { %499 = vmatprep.subr.bf16.mxu1 %v3219_v25  ;;  %585 = vmatprep.subr.bf16.mxu0 %v3223_v50  ;;  %v3812_v25 = vld [vmem:[#allocation5 + $0x1c] ss:$12 sps:$4 sm:$0xff]   ;;  %v3810_v29 = vld [vmem:[#allocation5 + $0x18] ss:$12 sps:$4 sm:$0xff]   ;;  %v3815_v31 = vld [vmem:[#allocation5 + $0x34] ss:$12 sps:$4 sm:$0xff]   ;;  %v3244_v49 = vcombine.low %v122_v37, %v126_v38 }
  0x3a   :  { %v3818_v39 = vld [vmem:[#allocation5 + $0x4c] ss:$12 sps:$4 sm:$0xff]   ;;  %v3827_v54 = vld [vmem:[#allocation5 + $0x94] ss:$12 sps:$4 sm:$0xff]   ;;  %v3825_v59 = vld [vmem:[#allocation5 + $0x90] ss:$12 sps:$4 sm:$0xff]  }
  0x3b   :  { %v68_v44 = vld [vmem:[#allocation2 + $0x18] sm:$0xff]  ;;  %v3819_v47 = vld [vmem:[#allocation5 + $0x60] ss:$12 sps:$4 sm:$0xff]  }
  0x3c   :  { %500 = vmatpush1.bf16.msra.mxu1 %v3218_v32  ;;  %586 = vmatpush1.bf16.msra.mxu0 %v3222_v56  ;;  %v3229_v32 = vcombine.high %v106_v27, %v110_v28  ;;  %v72_v45 = vld [vmem:[#allocation2 + $0x38] sm:$0xff]  ;;  %v3831_v9 = vld [vmem:[#allocation5 + $0xc0] ss:$12 sps:$4 sm:$0xff]   ;;  %v3853_v27 = vld [vmem:[#allocation5 + $0x124] ss:$12 sps:$4 sm:$0xff]  }
  0x3d   :  { %501 = vmatprep.subr.bf16.mxu1 %v3227_v34  ;;  %587 = vmatprep.subr.bf16.mxu0 %v3231_v60  ;;  %v118_v34 = vld [vmem:[#allocation2 + $0x1a8] sm:$0xff]  ;;  %v76_v50 = vld [vmem:[#allocation2 + $0x58] sm:$0xff]  ;;  %v3193_v52 = vcombine.high %v68_v44, %v72_v45  ;;  %v3192_v55 = vcombine.low %v68_v44, %v72_v45  ;;  %v3843_v15 = vld [vmem:[#allocation5 + $0xf4] ss:$12 sps:$4 sm:$0xff]  }
  0x3e   :  { %v3236_v43 = vcombine.low %v114_v33, %v118_v34  ;;  %v3822_v53 = vld [vmem:[#allocation5 + $0x78] ss:$12 sps:$4 sm:$0xff]   ;;  %v3838_v10 = vld [vmem:[#allocation5 + $0xdc] ss:$12 sps:$4 sm:$0xff]   ;;  %v3840_v37 = vld [vmem:[#allocation5 + $0x20] ss:$12 sps:$4 sm:$0xff]  }
  0x3f   :  { %v84_v56 = vld [vmem:[#allocation2 + $0x98] sm:$0xff]  ;;  %v3859_v44 = vld [vmem:[#allocation5 + $0x140] ss:$12 sps:$4 sm:$0xff]  }
  0x40   :  { %502 = vmatpush1.bf16.msra.mxu1 %v3226_v40  ;;  %588 = vmatpush1.bf16.msra.mxu0 %v3230_v3  ;;  %v3237_v40 = vcombine.high %v114_v33, %v118_v34  ;;  %v3830_v60 = vld [vmem:[#allocation5 + $0xac] ss:$12 sps:$4 sm:$0xff]   ;;  %v3828_v3 = vld [vmem:[#allocation5 + $0xa8] ss:$12 sps:$4 sm:$0xff]  }
  0x41   :  { %503 = vmatprep.subr.bf16.mxu1 %v3235_v42  ;;  %589 = vmatprep.subr.bf16.mxu0 %v3239_v7  ;;  %v3821_v42 = vld [vmem:[#allocation5 + $0x64] ss:$12 sps:$4 sm:$0xff]   ;;  %v92_v62 = vld [vmem:[#allocation2 + $0xd8] sm:$0xff]  ;;  %v3860_v45 = vld [vmem:[#allocation5 + $0x80] ss:$12 sps:$4 sm:$0xff]  }
  0x42   :  { %v96_v63 = vld [vmem:[#allocation2 + $0xf8] sm:$0xff] }
  0x43   :  { %v104_v7 = vld [vmem:[#allocation2 + $0x138] sm:$0xff]  ;;  %v3217_v8 = vcombine.high %v92_v62, %v96_v63 }
  0x44   :  { %504 = vmatpush1.bf16.msra.mxu1 %v3234_v48  ;;  %590 = vmatpush1.bf16.msra.mxu0 %v3238_v11  ;;  %v3824_v48 = vld [vmem:[#allocation5 + $0x7c] ss:$12 sps:$4 sm:$0xff]   ;;  %v3216_v11 = vcombine.low %v92_v62, %v96_v63  ;;  %v3848_v21 = vld [vmem:[#allocation5 + $0x10c] ss:$12 sps:$4 sm:$0xff]  }
  0x45   :  { %505 = vmatprep.subr.bf16.mxu1 %v3243_v51  ;;  %591 = vmatprep.subr.bf16.mxu0 %v3247_v13  ;;  %v80_v51 = vld [vmem:[#allocation2 + $0x78] sm:$0xff] }
  0x46   :  { %v3201_v58 = vcombine.high %v76_v50, %v80_v51  ;;  %v3856_v34 = vld [vmem:[#allocation5 + $0x138] ss:$12 sps:$4 sm:$0xff]  }
  0x47   :  { %v3844_v38 = vld [vmem:[#allocation5 + $0xf8] ss:$12 sps:$4 sm:$0xff]  }
  0x48   :  { %506 = vmatpush1.bf16.msra.mxu1 %v3242_v57  ;;  %592 = vmatpush1.bf16.msra.mxu0 %v3246_v17  ;;  %v88_v57 = vld [vmem:[#allocation2 + $0xb8] sm:$0xff] }
  0x49   :  { %534 = vmatprep.subr.bf16.mxu1 %v3189_v61  ;;  %1967 = vmatprep.subr.bf16.mxu0 %v3809_v19  ;;  %v3200_v61 = vcombine.low %v76_v50, %v80_v51  ;;  %v3209_v1 = vcombine.high %v84_v56, %v88_v57  ;;  %v3208_v5 = vcombine.low %v84_v56, %v88_v57  ;;  %v116_v17 = vld [vmem:[#allocation2 + $0x198] sm:$0xff]  ;;  %v3866_v51 = vld [vmem:[#allocation5 + $0x168] ss:$12 sps:$4 sm:$0xff]  }
  0x4a   :  { %v3869_v50 = vld [vmem:[#allocation5 + $0x170] ss:$12 sps:$4 sm:$0xff]  }
  0x4b   :  { %524 = vmatmul.mubr.bf16.vlgmr.msra.gmra.mrb[0].mxu1 %v4257_v2  ;;  %610 = vmatmul.mubr.bf16.vlgmr.msra.gmra.mrb[0].mxu0 %v4257_v2 }
  0x4c   :  { %535 = vmatpush1.bf16.msra.mxu1 %v3188_v4  ;;  %566 = vmatprep.mubr.bf16.mxu1 %v4163_v0  ;;  %v3833_v4 = vld [vmem:[#allocation5 + $0xc4] ss:$12 sps:$4 sm:$0xff]  }
  0x4d   :  { %536 = vmatprep.subr.bf16.mxu1 %v3197_v6  ;;  %1968 = vmatpush1.bf16.msra.mxu0 %v3807_v23  ;;  %v100_v6 = vld [vmem:[#allocation2 + $0x118] sm:$0xff] }
  0x4e   :  { %1969 = vmatprep.subr.bf16.mxu0 %v3812_v25  ;;  %v3225_v13 = vcombine.high %v100_v6, %v104_v7  ;;  %v3224_v16 = vcombine.low %v100_v6, %v104_v7  ;;  %v124_v23 = vld [vmem:[#allocation2 + $0x1d8] sm:$0xff] }
  0x50   :  { %537 = vmatpush1.bf16.msra.mxu1 %v3196_v12  ;;  %v108_v12 = vld [vmem:[#allocation2 + $0x158] sm:$0xff] }
  0x51   :  { %538 = vmatprep.subr.bf16.mxu1 %v3205_v14  ;;  %1970 = vmatpush1.bf16.msra.mxu0 %v3810_v29  ;;  %v3836_v14 = vld [vmem:[#allocation5 + $0xd8] ss:$12 sps:$4 sm:$0xff]  }
  0x52   :  { %1971 = vmatprep.subr.bf16.mxu0 %v3815_v31  ;;  %v3858_v31 = vld [vmem:[#allocation5 + $0x13c] ss:$12 sps:$4 sm:$0xff]  }
  0x54   :  { %539 = vmatpush1.bf16.msra.mxu1 %v3204_v18  ;;  %v120_v18 = vld [vmem:[#allocation2 + $0x1b8] sm:$0xff] }
  0x55   :  { %540 = vmatprep.subr.bf16.mxu1 %v3213_v20  ;;  %1972 = vmatpush1.bf16.msra.mxu0 %v3813_v35  ;;  %v3841_v20 = vld [vmem:[#allocation5 + $0xf0] ss:$12 sps:$4 sm:$0xff]   ;;  %v3241_v25 = vcombine.high %v116_v17, %v120_v18  ;;  %v3240_v28 = vcombine.low %v116_v17, %v120_v18  ;;  %v3835_v35 = vld [vmem:[#allocation5 + $0x8] ss:$12 sps:$4 sm:$0xff]  }
  0x56   :  { %1973 = vmatprep.subr.bf16.mxu0 %v3818_v39  ;;  %v3845_v39 = vld [vmem:[#allocation5 + $0x38] ss:$12 sps:$4 sm:$0xff]   ;;  %v3878_v18 = vld [vmem:[#allocation5 + $0x19c] ss:$12 sps:$4 sm:$0xff]  }
  0x58   :  { %541 = vmatpush1.bf16.msra.mxu1 %v3212_v24  ;;  %v128_v24 = vld [vmem:[#allocation2 + $0x1f8] sm:$0xff] }
  0x59   :  { %542 = vmatprep.subr.bf16.mxu1 %v3221_v26  ;;  %1974 = vmatpush1.bf16.msra.mxu0 %v3816_v41  ;;  %v3846_v26 = vld [vmem:[#allocation5 + $0x108] ss:$12 sps:$4 sm:$0xff]   ;;  %v3249_v29 = vcombine.high %v124_v23, %v128_v24  ;;  %v3248_v33 = vcombine.low %v124_v23, %v128_v24  ;;  %v3850_v41 = vld [vmem:[#allocation5 + $0x50] ss:$12 sps:$4 sm:$0xff]   ;;  %v3880_v23 = vld [vmem:[#allocation5 + $0x1a0] ss:$12 sps:$4 sm:$0xff]  }
  0x5a   :  { %1975 = vmatprep.subr.bf16.mxu0 %v3821_v42  ;;  %v3854_v42 = vld [vmem:[#allocation5 + $0x128] ss:$12 sps:$4 sm:$0xff]  }
  0x5c   :  { %543 = vmatpush1.bf16.msra.mxu1 %v3220_v30  ;;  %v3851_v30 = vld [vmem:[#allocation5 + $0x120] ss:$12 sps:$4 sm:$0xff]  }
  0x5d   :  { %544 = vmatprep.subr.bf16.mxu1 %v3229_v32  ;;  %1976 = vmatpush1.bf16.msra.mxu0 %v3819_v47  ;;  %v3834_v32 = vld [vmem:[#allocation5 + $0xc8] ss:$12 sps:$4 sm:$0xff]   ;;  %v3861_v47 = vld [vmem:[#allocation5 + $0x150] ss:$12 sps:$4 sm:$0xff]  }
  0x5e   :  { %1977 = vmatprep.subr.bf16.mxu0 %v3824_v48  ;;  %v3865_v48 = vld [vmem:[#allocation5 + $0x98] ss:$12 sps:$4 sm:$0xff]  }
  0x60   :  { %545 = vmatpush1.bf16.msra.mxu1 %v3228_v36  ;;  %v3839_v36 = vld [vmem:[#allocation5 + $0xe0] ss:$12 sps:$4 sm:$0xff]  }
  0x61   :  { %546 = vmatprep.subr.bf16.mxu1 %v3237_v40  ;;  %1978 = vmatpush1.bf16.msra.mxu0 %v3822_v53  ;;  %v3849_v40 = vld [vmem:[#allocation5 + $0x110] ss:$12 sps:$4 sm:$0xff]  }
  0x62   :  { %1979 = vmatprep.subr.bf16.mxu0 %v3827_v54  ;;  %v3873_v53 = vld [vmem:[#allocation5 + $0x184] ss:$12 sps:$4 sm:$0xff]   ;;  %v3874_v54 = vld [vmem:[#allocation5 + $0x248] ss:$12 sps:$4 sm:$0xff]  }
  0x64   :  { %547 = vmatpush1.bf16.msra.mxu1 %v3236_v43  ;;  %v3855_v43 = vld [vmem:[#allocation5 + $0x68] ss:$12 sps:$4 sm:$0xff]  }
  0x65   :  { %548 = vmatprep.subr.bf16.mxu1 %v3245_v46  ;;  %1980 = vmatpush1.bf16.msra.mxu0 %v3825_v59  ;;  %v3864_v46 = vld [vmem:[#allocation5 + $0x158] ss:$12 sps:$4 sm:$0xff]  }
  0x66   :  { %1981 = vmatprep.subr.bf16.mxu0 %v3830_v60 }
  0x68   :  { %549 = vmatpush1.bf16.msra.mxu1 %v3244_v49  ;;  %v3868_v49 = vld [vmem:[#allocation5 + $0x16c] ss:$12 sps:$4 sm:$0xff]  }
  0x69   :  { %620 = vmatprep.subr.bf16.mxu1 %v3193_v52  ;;  %1982 = vmatpush1.bf16.msra.mxu0 %v3828_v3  ;;  %v3870_v52 = vld [vmem:[#allocation5 + $0xb0] ss:$12 sps:$4 sm:$0xff]  }
  0x6a   :  { %1983 = vmatprep.subr.bf16.mxu0 %v3833_v4 }
  0x6b   :  { %567 = vmatmul.mubr.bf16.vlgmr.msra.gmra.mrb[4].mxu1 %v4257_v2 }
  0x6c   :  { %621 = vmatpush1.bf16.msra.mxu1 %v3192_v55  ;;  %652 = vmatprep.mubr.bf16.mxu1 %v4163_v0  ;;  %v112_v0 = vld [vmem:[#allocation2 + $0x178] sm:$0xff]  ;;  %v131_v55 = vlaneseq }
  0x6d   :  { %622 = vmatprep.subr.bf16.mxu1 %v3201_v58  ;;  %1984 = vmatpush1.bf16.msra.mxu0 %v3831_v9  ;;  %v3233_v19 = vcombine.high %v108_v12, %v112_v0  ;;  %v3232_v22 = vcombine.low %v108_v12, %v112_v0  ;;  %v4271_v58 = vld [vmem:[%s4563_s2] sm:$0xff] }
  0x6e   :  { %1985 = vmatprep.subr.bf16.mxu0 %v3838_v10  ;;  %v4265_v56 = vshrl.u32 %v131_v55, 7  ;;  %v3903_v55 = vld [vmem:[#allocation5 + $0x214] ss:$12 sps:$4 sm:$0xff]  }
  0x70   :  { %623 = vmatpush1.bf16.msra.mxu1 %v3200_v61  ;;  %v133_v57 = vsub.s32 0, %v4265_v56  ;;  %v137_v59 = vsub.s32 1, %v4265_v56 }
  0x71   :  { %624 = vmatprep.subr.bf16.mxu1 %v3209_v1  ;;  %1986 = vmatpush1.bf16.msra.mxu0 %v3836_v14 }
  0x72   :  { %1987 = vmatprep.subr.bf16.mxu0 %v3843_v15  ;;  %v134_v60 = vrot.slane %v4271_v58, %v133_v57  ;;  %v138_v61 = vrot.slane %v4271_v58, %v137_v59  ;;  %v3871_v15 = vld [vmem:[#allocation5 + $0x180] ss:$12 sps:$4 sm:$0xff]   ;;  %v3904_v57 = vld [vmem:[#allocation5 + $0x2d8] ss:$12 sps:$4 sm:$0xff]  }
  0x74   :  { %625 = vmatpush1.bf16.msra.mxu1 %v3208_v5 }
  0x75   :  { %626 = vmatprep.subr.bf16.mxu1 %v3217_v8  ;;  %1988 = vmatpush1.bf16.msra.mxu0 %v3841_v20  ;;  %v149_v8 = vsub.s32 4, %v4265_v56 }
  0x76   :  { %1989 = vmatprep.subr.bf16.mxu0 %v3848_v21 }
  0x77   :  { %v150_v17 = vrot.slane %v4271_v58, %v149_v8 }
  0x78   :  { %627 = vmatpush1.bf16.msra.mxu1 %v3216_v11  ;;  %v153_v11 = vsub.s32 5, %v4265_v56 }
  0x79   :  { %628 = vmatprep.subr.bf16.mxu1 %v3225_v13  ;;  %1990 = vmatpush1.bf16.msra.mxu0 %v3846_v26  ;;  %v3883_v26 = vld [vmem:[#allocation5 + $0x1b4] ss:$12 sps:$4 sm:$0xff]  }
  0x7a   :  { %1991 = vmatprep.subr.bf16.mxu0 %v3853_v27  ;;  %v154_v20 = vrot.slane %v4271_v58, %v153_v11  ;;  %v3884_v27 = vld [vmem:[#allocation5 + $0x278] ss:$12 sps:$4 sm:$0xff]  }
  0x7c   :  { %629 = vmatpush1.bf16.msra.mxu1 %v3224_v16  ;;  %v3875_v16 = vld [vmem:[#allocation5 + $0x188] ss:$12 sps:$4 sm:$0xff]  }
  0x7d   :  { %630 = vmatprep.subr.bf16.mxu1 %v3233_v19  ;;  %1992 = vmatpush1.bf16.msra.mxu0 %v3851_v30  ;;  %v3879_v19 = vld [vmem:[#allocation5 + $0x260] ss:$12 sps:$4 sm:$0xff]  }
  0x7e   :  { %1993 = vmatprep.subr.bf16.mxu0 %v3858_v31 }
  0x80   :  { %631 = vmatpush1.bf16.msra.mxu1 %v3232_v22  ;;  %v3876_v22 = vld [vmem:[#allocation5 + $0x198] ss:$12 sps:$4 sm:$0xff]  }
  0x81   :  { %632 = vmatprep.subr.bf16.mxu1 %v3241_v25  ;;  %1994 = vmatpush1.bf16.msra.mxu0 %v3856_v34 }
  0x84   :  { %633 = vmatpush1.bf16.msra.mxu1 %v3240_v28 }
  0x85   :  { %634 = vmatprep.subr.bf16.mxu1 %v3249_v29 }
  0x88   :  { %635 = vmatpush1.bf16.msra.mxu1 %v3248_v33 }
  0x89   :  { %3463 = vmatprep.subr.bf16.mxu1 %v3834_v32 }
  0x8b   :  { %653 = vmatmul.mubr.bf16.vlgmr.msra.gmra.mrb[8].mxu1 %v4257_v2  ;;  %v3863_v2 = vld [vmem:[#allocation5 + $0x154] ss:$12 sps:$4 sm:$0xff]  }
  0x8c   :  { %3464 = vmatpush3.bf16.msra.mxu1 %v3835_v35  ;;  %1995 = vmatprep.subr.bf16.mxu0 %v3863_v2  ;;  %v3881_v35 = vld [vmem:[#allocation5 + $0x1b0] ss:$12 sps:$4 sm:$0xff]   ;;  %v3894_v2 = vld [vmem:[#allocation5 + $0x2a8] ss:$12 sps:$4 sm:$0xff]  }
  0x8d   :  { %3465 = vmatprep.subr.bf16.mxu1 %v3839_v36  ;;  %1996 = vmatpush1.bf16.msra.mxu0 %v3861_v47  ;;  %v3885_v36 = vld [vmem:[#allocation5 + $0x1b8] ss:$12 sps:$4 sm:$0xff]   ;;  %v3895_v47 = vld [vmem:[#allocation5 + $0x1e8] ss:$12 sps:$4 sm:$0xff]  }
  0x8e   :  { %1997 = vmatprep.subr.bf16.mxu0 %v3868_v49  ;;  %v3899_v49 = vld [vmem:[#allocation5 + $0x2c0] ss:$12 sps:$4 sm:$0xff]  }
  0x90   :  { %3466 = vmatpush3.bf16.msra.mxu1 %v3840_v37 }
  0x91   :  { %3467 = vmatprep.subr.bf16.mxu1 %v3844_v38  ;;  %1998 = vmatpush1.bf16.msra.mxu0 %v3866_v51  ;;  %v3888_v38 = vld [vmem:[#allocation5 + $0x1cc] ss:$12 sps:$4 sm:$0xff]   ;;  %v145_v51 = vsub.s32 3, %v4265_v56 }
  0x92   :  { %2010 = vmatprep.subr.bf16.mxu0 %v3873_v53  ;;  %v3900_v53 = vld [vmem:[#allocation5 + $0x200] ss:$12 sps:$4 sm:$0xff]  }
  0x93   :  { %v146_v59 = vrot.slane %v4271_v58, %v145_v51  ;;  %v3949_v51 = vld [vmem:[#allocation5 + $0x470] ss:$12 sps:$4 sm:$0xff]  }
  0x94   :  { %3468 = vmatpush3.bf16.msra.mxu1 %v3845_v39  ;;  %v3889_v39 = vld [vmem:[#allocation5 + $0x290] ss:$12 sps:$4 sm:$0xff]  }
  0x95   :  { %3469 = vmatprep.subr.bf16.mxu1 %v3849_v40 }
  0x98   :  { %3470 = vmatpush3.bf16.msra.mxu1 %v3850_v41 }
  0x99   :  { %3471 = vmatprep.subr.bf16.mxu1 %v3854_v42 }
  0x9c   :  { %3472 = vmatpush3.bf16.msra.mxu1 %v3855_v43  ;;  %v3886_v43 = vld [vmem:[#allocation5 + $0x1c8] ss:$12 sps:$4 sm:$0xff]  }
  0x9d   :  { %3473 = vmatprep.subr.bf16.mxu1 %v3859_v44  ;;  %v3890_v44 = vld [vmem:[#allocation5 + $0x1d0] ss:$12 sps:$4 sm:$0xff]  }
  0xa0   :  { %3474 = vmatpush3.bf16.msra.mxu1 %v3860_v45  ;;  %v3893_v45 = vld [vmem:[#allocation5 + $0x1e4] ss:$12 sps:$4 sm:$0xff]  }
  0xa1   :  { %3475 = vmatprep.subr.bf16.mxu1 %v3864_v46  ;;  %v3891_v46 = vld [vmem:[#allocation5 + $0x1e0] ss:$12 sps:$4 sm:$0xff]  }
  0xa4   :  { %3476 = vmatpush3.bf16.msra.mxu1 %v3865_v48  ;;  %v3898_v48 = vld [vmem:[#allocation5 + $0x1fc] ss:$12 sps:$4 sm:$0xff]  }
  0xa5   :  { %3477 = vmatprep.subr.bf16.mxu1 %v3869_v50  ;;  %v141_v50 = vsub.s32 2, %v4265_v56 }
  0xa8   :  { %3478 = vmatpush3.bf16.msra.mxu1 %v3870_v52  ;;  %v3896_v52 = vld [vmem:[#allocation5 + $0x1f8] ss:$12 sps:$4 sm:$0xff]  }
  0xa9   :  { %3485 = vmatprep.subr.bf16.mxu1 %v3874_v54  ;;  %v142_v54 = vrot.slane %v4271_v58, %v141_v50 }
 0x11e   :  { %v525_v62 = vpop.f32.mrb[0].mxu1  ;;  %v611_v21 = vpop.f32.mrb[0].mxu0 }
 0x11f   :  { %v526_v63 = vadd.f32 %v525_v62, %v134_v60  ;;  %v527_v1 = vpop.f32.mrb[1].mxu1  ;;  %v612_v24 = vadd.f32 %v611_v21, %v150_v17  ;;  %v613_v25 = vpop.f32.mrb[1].mxu0  ;;  %v3905_v62 = vld [vmem:[#allocation5 + $0x218] ss:$12 sps:$4 sm:$0xff]   ;;  %v3918_v21 = vld [vmem:[#allocation5 + $0x25c] ss:$12 sps:$4 sm:$0xff]  }
 0x120   :  { %v528_v3 = vadd.f32 %v527_v1, %v138_v61  ;;  %v529_v4 = vpop.f32.mrb[2].mxu1  ;;  %v614_v28 = vadd.f32 %v613_v25, %v154_v20  ;;  %v615_v29 = vpop.f32.mrb[2].mxu0  ;;  %v3923_v25 = vld [vmem:[#allocation5 + $0x274] ss:$12 sps:$4 sm:$0xff]  }
 0x121   :  { %v530_v5 = vadd.f32 %v529_v4, %v134_v60  ;;  %v531_v6 = vpop.f32.mrb[3].mxu1  ;;  %v663_v9 = vmax.f32 %v526_v63, 0.0  ;;  %v667_v30 = vmax.f32 %v612_v24, 0.0  ;;  %v616_v31 = vadd.f32 %v615_v29, %v150_v17  ;;  %v617_v32 = vpop.f32.mrb[3].mxu0  ;;  %v3909_v4 = vld [vmem:[#allocation5 + $0x2f0] ss:$12 sps:$4 sm:$0xff]  }
 0x122   :  { %v532_v7 = vadd.f32 %v531_v6, %v138_v61  ;;  %v664_v12 = vmax.f32 %v528_v3, 0.0  ;;  %v668_v33 = vmax.f32 %v614_v28, 0.0  ;;  %v618_v34 = vadd.f32 %v617_v32, %v154_v20  ;;  %v3901_v61 = vld [vmem:[#allocation5 + $0x210] ss:$12 sps:$4 sm:$0xff]   ;;  %v3908_v3 = vld [vmem:[#allocation5 + $0x22c] ss:$12 sps:$4 sm:$0xff]  }
 0x123   :  { %v671_v10 = vmax.f32 %v530_v5, 0.0  ;;  %v675_v37 = vmax.f32 %v616_v31, 0.0  ;;  %v3915_v20 = vld [vmem:[#allocation5 + $0x308] ss:$12 sps:$4 sm:$0xff]   ;;  %v3920_v24 = vld [vmem:[#allocation5 + $0x320] ss:$12 sps:$4 sm:$0xff]  }
 0x124   :  { %v672_v0 = vmax.f32 %v532_v7, 0.0  ;;  %v676_v40 = vmax.f32 %v618_v34, 0.0  ;;  %v3925_v28 = vld [vmem:[#allocation5 + $0x338] ss:$12 sps:$4 sm:$0xff]   ;;  %v3926_v31 = vld [vmem:[#allocation5 + $0x288] ss:$12 sps:$4 sm:$0xff]  }
 0x125   :  { %v679_v13 = vpack.c.bf16 %v671_v10, %v663_v9  ;;  %v4280_v41 = vpack.c.bf16 %v675_v37, %v667_v30  ;;  %v3928_v29 = vld [vmem:[#allocation5 + $0x28c] ss:$12 sps:$4 sm:$0xff]   ;;  %v3929_v30 = vld [vmem:[#allocation5 + $0x410] ss:$12 sps:$4 sm:$0xff]   ;;  %v3934_v34 = vld [vmem:[#allocation5 + $0x428] ss:$12 sps:$4 sm:$0xff]  }
 0x126   :  { %v680_v14 = vpack.c.bf16 %v672_v0, %v664_v12  ;;  %v4282_v42 = vpack.c.bf16 %v676_v40, %v668_v33  ;;  %v3906_v12 = vld [vmem:[#allocation5 + $0x228] ss:$12 sps:$4 sm:$0xff]   ;;  %v3910_v0 = vld [vmem:[#allocation5 + $0x230] ss:$12 sps:$4 sm:$0xff]   ;;  %v161_v40 = vsub.s32 7, %v4265_v56 }
 0x127   :  { %v3930_v32 = vld [vmem:[#allocation5 + $0x350] ss:$12 sps:$4 sm:$0xff]  }
 0x128   :  { %1999 = vmatprep.mubr.bf16.mxu0 %v680_v14  ;;  %2171 = vmatprep.mubr.bf16.mxu1 %v680_v14  ;;  %v3913_v14 = vld [vmem:[#allocation5 + $0x244] ss:$12 sps:$4 sm:$0xff]   ;;  %v3938_v37 = vld [vmem:[#allocation5 + $0x2bc] ss:$12 sps:$4 sm:$0xff]  }
 0x129   :  { %2000 = vmatmul.mubr.bf16.vlgmr.msra.gmra.mrb[4].mxu0 %v679_v13  ;;  %2172 = vmatmul.mubr.bf16.vlgmr.msra.gmra.mrb[12].mxu1 %v679_v13  ;;  %v3933_v33 = vld [vmem:[#allocation5 + $0x2a4] ss:$12 sps:$4 sm:$0xff]  }
 0x12a   :  { %2011 = vmatpush1.bf16.msra.mxu0 %v3871_v15  ;;  %3486 = vmatpush3.bf16.msra.mxu1 %v3875_v16  ;;  %v3914_v15 = vld [vmem:[#allocation5 + $0x3c8] ss:$12 sps:$4 sm:$0xff]  }
 0x12b   :  { %2012 = vmatprep.subr.bf16.mxu0 %v3878_v18  ;;  %3487 = vmatprep.subr.bf16.mxu1 %v3879_v19  ;;  %v3911_v19 = vld [vmem:[#allocation5 + $0x240] ss:$12 sps:$4 sm:$0xff]  }
 0x12e   :  { %2013 = vmatpush1.bf16.msra.mxu0 %v3876_v22  ;;  %3488 = vmatpush3.bf16.msra.mxu1 %v3880_v23  ;;  %v3919_v22 = vld [vmem:[#allocation5 + $0x3e0] ss:$12 sps:$4 sm:$0xff]   ;;  %v3916_v23 = vld [vmem:[#allocation5 + $0x258] ss:$12 sps:$4 sm:$0xff]  }
 0x12f   :  { %2014 = vmatprep.subr.bf16.mxu0 %v3883_v26  ;;  %3489 = vmatprep.subr.bf16.mxu1 %v3884_v27  ;;  %v3924_v26 = vld [vmem:[#allocation5 + $0x3f8] ss:$12 sps:$4 sm:$0xff]   ;;  %v3921_v27 = vld [vmem:[#allocation5 + $0x270] ss:$12 sps:$4 sm:$0xff]  }
 0x132   :  { %2015 = vmatpush1.bf16.msra.mxu0 %v3881_v35  ;;  %3490 = vmatpush3.bf16.msra.mxu1 %v3885_v36  ;;  %v3931_v35 = vld [vmem:[#allocation5 + $0x2a0] ss:$12 sps:$4 sm:$0xff]   ;;  %v3935_v36 = vld [vmem:[#allocation5 + $0x368] ss:$12 sps:$4 sm:$0xff]  }
 0x133   :  { %2016 = vmatprep.subr.bf16.mxu0 %v3888_v38  ;;  %3491 = vmatprep.subr.bf16.mxu1 %v3889_v39  ;;  %v3939_v38 = vld [vmem:[#allocation5 + $0x440] ss:$12 sps:$4 sm:$0xff]   ;;  %v157_v39 = vsub.s32 6, %v4265_v56 }
 0x134   :  { %v3948_v56 = vld [vmem:[#allocation5 + $0x2ec] ss:$12 sps:$4 sm:$0xff]  }
 0x136   :  { %2017 = vmatpush1.bf16.msra.mxu0 %v3886_v43  ;;  %3492 = vmatpush3.bf16.msra.mxu1 %v3890_v44  ;;  %v3936_v43 = vld [vmem:[#allocation5 + $0x2b8] ss:$12 sps:$4 sm:$0xff]   ;;  %v3940_v44 = vld [vmem:[#allocation5 + $0x380] ss:$12 sps:$4 sm:$0xff]  }
 0x137   :  { %2018 = vmatprep.subr.bf16.mxu0 %v3893_v45  ;;  %3493 = vmatprep.subr.bf16.mxu1 %v3894_v2  ;;  %v3943_v45 = vld [vmem:[#allocation5 + $0x2d4] ss:$12 sps:$4 sm:$0xff]   ;;  %v3944_v2 = vld [vmem:[#allocation5 + $0x458] ss:$12 sps:$4 sm:$0xff]  }
 0x13a   :  { %2019 = vmatpush1.bf16.msra.mxu0 %v3891_v46  ;;  %3494 = vmatpush3.bf16.msra.mxu1 %v3895_v47  ;;  %v158_v46 = vrot.slane %v4271_v58, %v157_v39  ;;  %v162_v47 = vrot.slane %v4271_v58, %v161_v40  ;;  %v3950_v58 = vld [vmem:[#allocation5 + $0x3b0] ss:$12 sps:$4 sm:$0xff]   ;;  %v3994_v39 = vld [vmem:[#allocation5 + $0x3d8] ss:$12 sps:$4 sm:$0xff]   ;;  %v3999_v40 = vld [vmem:[#allocation5 + $0x3f4] ss:$12 sps:$4 sm:$0xff]  }
 0x13b   :  { %2020 = vmatprep.subr.bf16.mxu0 %v3898_v48  ;;  %3495 = vmatprep.subr.bf16.mxu1 %v3899_v49  ;;  %v3941_v48 = vld [vmem:[#allocation5 + $0x2d0] ss:$12 sps:$4 sm:$0xff]   ;;  %v3945_v49 = vld [vmem:[#allocation5 + $0x398] ss:$12 sps:$4 sm:$0xff]  }
 0x13e   :  { %2021 = vmatpush1.bf16.msra.mxu0 %v3896_v52  ;;  %3496 = vmatpush3.bf16.msra.mxu1 %v3900_v53  ;;  %v568_v60 = vpop.f32.mrb[4].mxu1 }
 0x13f   :  { %v569_v63 = vadd.f32 %v568_v60, %v142_v54  ;;  %v570_v1 = vpop.f32.mrb[5].mxu1  ;;  %2022 = vmatprep.subr.bf16.mxu0 %v3903_v55  ;;  %3497 = vmatprep.subr.bf16.mxu1 %v3904_v57 }
 0x140   :  { %v571_v5 = vadd.f32 %v570_v1, %v146_v59  ;;  %v572_v6 = vpop.f32.mrb[6].mxu1  ;;  %v3953_v1 = vld [vmem:[#allocation5 + $0x304] ss:$12 sps:$4 sm:$0xff]  }
 0x141   :  { %v665_v7 = vmax.f32 %v569_v63, 0.0  ;;  %v573_v8 = vadd.f32 %v572_v6, %v142_v54  ;;  %v574_v9 = vpop.f32.mrb[7].mxu1 }
 0x142   :  { %v666_v10 = vmax.f32 %v571_v5, 0.0  ;;  %v575_v11 = vadd.f32 %v574_v9, %v146_v59  ;;  %2023 = vmatpush1.bf16.msra.mxu0 %v3901_v61  ;;  %3498 = vmatpush3.bf16.msra.mxu1 %v3905_v62  ;;  %v3946_v61 = vld [vmem:[#allocation5 + $0x2e8] ss:$12 sps:$4 sm:$0xff]  }
 0x143   :  { %v673_v13 = vmax.f32 %v573_v8, 0.0  ;;  %2024 = vmatprep.subr.bf16.mxu0 %v3908_v3  ;;  %3499 = vmatprep.subr.bf16.mxu1 %v3909_v4  ;;  %v3954_v3 = vld [vmem:[#allocation5 + $0x548] ss:$12 sps:$4 sm:$0xff]  }
 0x144   :  { %v674_v16 = vmax.f32 %v575_v11, 0.0  ;;  %v3955_v8 = vld [vmem:[#allocation5 + $0x488] ss:$12 sps:$4 sm:$0xff]   ;;  %v3959_v11 = vld [vmem:[#allocation5 + $0x560] ss:$12 sps:$4 sm:$0xff]  }
 0x145   :  { %v4288_v17 = vpack.c.bf16 %v673_v13, %v665_v7  ;;  %v3951_v7 = vld [vmem:[#allocation5 + $0x300] ss:$12 sps:$4 sm:$0xff]  }
 0x146   :  { %v682_v18 = vpack.c.bf16 %v674_v16, %v666_v10  ;;  %2025 = vmatpush1.bf16.msra.mxu0 %v3906_v12  ;;  %3500 = vmatpush3.bf16.msra.mxu1 %v3910_v0  ;;  %v3958_v10 = vld [vmem:[#allocation5 + $0x31c] ss:$12 sps:$4 sm:$0xff]   ;;  %v3956_v12 = vld [vmem:[#allocation5 + $0x318] ss:$12 sps:$4 sm:$0xff]   ;;  %v3960_v0 = vld [vmem:[#allocation5 + $0x4a0] ss:$12 sps:$4 sm:$0xff]  }
 0x147   :  { %2026 = vmatprep.subr.bf16.mxu0 %v3913_v14  ;;  %3507 = vmatprep.subr.bf16.mxu1 %v3914_v15  ;;  %v3963_v13 = vld [vmem:[#allocation5 + $0x334] ss:$12 sps:$4 sm:$0xff]   ;;  %v3964_v14 = vld [vmem:[#allocation5 + $0x578] ss:$12 sps:$4 sm:$0xff]   ;;  %v3961_v15 = vld [vmem:[#allocation5 + $0x330] ss:$12 sps:$4 sm:$0xff]  }
 0x148   :  { %2212 = vmatprep.mubr.bf16.mxu1 %v682_v18  ;;  %2042 = vmatprep.mubr.bf16.mxu0 %v682_v18  ;;  %v3965_v16 = vld [vmem:[#allocation5 + $0x4b8] ss:$12 sps:$4 sm:$0xff]   ;;  %v3969_v18 = vld [vmem:[#allocation5 + $0x590] ss:$12 sps:$4 sm:$0xff]  }
 0x149   :  { %2213 = vmatmul.mubr.bf16.vlgmr.msra.gmra.mrb[16].mxu1 %v4288_v17 }
 0x14a   :  { %2027 = vmatpush1.bf16.msra.mxu0 %v3911_v19  ;;  %3508 = vmatpush3.bf16.msra.mxu1 %v3915_v20  ;;  %v3966_v19 = vld [vmem:[#allocation5 + $0x348] ss:$12 sps:$4 sm:$0xff]   ;;  %v3970_v20 = vld [vmem:[#allocation5 + $0x4d0] ss:$12 sps:$4 sm:$0xff]  }
 0x14b   :  { %2028 = vmatprep.subr.bf16.mxu0 %v3918_v21  ;;  %3509 = vmatprep.subr.bf16.mxu1 %v3919_v22  ;;  %v3973_v21 = vld [vmem:[#allocation5 + $0x364] ss:$12 sps:$4 sm:$0xff]   ;;  %v3974_v22 = vld [vmem:[#allocation5 + $0x5a8] ss:$12 sps:$4 sm:$0xff]  }
 0x14c   :  { %2253 = vmatprep.mubr.bf16.mxu1 %v4282_v42 }
 0x14e   :  { %2029 = vmatpush1.bf16.msra.mxu0 %v3916_v23  ;;  %3510 = vmatpush3.bf16.msra.mxu1 %v3920_v24  ;;  %v3971_v23 = vld [vmem:[#allocation5 + $0x360] ss:$12 sps:$4 sm:$0xff]   ;;  %v3978_v24 = vld [vmem:[#allocation5 + $0x37c] ss:$12 sps:$4 sm:$0xff]  }
 0x14f   :  { %2030 = vmatprep.subr.bf16.mxu0 %v3923_v25  ;;  %3511 = vmatprep.subr.bf16.mxu1 %v3924_v26  ;;  %v3979_v25 = vld [vmem:[#allocation5 + $0x5c0] ss:$12 sps:$4 sm:$0xff]   ;;  %v3976_v26 = vld [vmem:[#allocation5 + $0x378] ss:$12 sps:$4 sm:$0xff]  }
 0x152   :  { %2031 = vmatpush1.bf16.msra.mxu0 %v3921_v27  ;;  %3512 = vmatpush3.bf16.msra.mxu1 %v3925_v28  ;;  %v3980_v27 = vld [vmem:[#allocation5 + $0x500] ss:$12 sps:$4 sm:$0xff]  }
 0x153   :  { %2032 = vmatprep.subr.bf16.mxu0 %v3928_v29  ;;  %3513 = vmatprep.subr.bf16.mxu1 %v3929_v30  ;;  %v3983_v28 = vld [vmem:[#allocation5 + $0x394] ss:$12 sps:$4 sm:$0xff]   ;;  %v3984_v29 = vld [vmem:[#allocation5 + $0x5d8] ss:$12 sps:$4 sm:$0xff]   ;;  %v3981_v30 = vld [vmem:[#allocation5 + $0x390] ss:$12 sps:$4 sm:$0xff]  }
 0x156   :  { %2033 = vmatpush1.bf16.msra.mxu0 %v3926_v31  ;;  %3514 = vmatpush3.bf16.msra.mxu1 %v3930_v32  ;;  %v3985_v31 = vld [vmem:[#allocation5 + $0x518] ss:$12 sps:$4 sm:$0xff]  }
 0x157   :  { %2034 = vmatprep.subr.bf16.mxu0 %v3933_v33  ;;  %3515 = vmatprep.subr.bf16.mxu1 %v3934_v34  ;;  %v3988_v32 = vld [vmem:[#allocation5 + $0x3ac] ss:$12 sps:$4 sm:$0xff]   ;;  %v3989_v33 = vld [vmem:[#allocation5 + $0x5f0] ss:$12 sps:$4 sm:$0xff]   ;;  %v3986_v34 = vld [vmem:[#allocation5 + $0x3a8] ss:$12 sps:$4 sm:$0xff]  }
 0x15a   :  { %2035 = vmatpush1.bf16.msra.mxu0 %v3931_v35  ;;  %3516 = vmatpush3.bf16.msra.mxu1 %v3935_v36  ;;  %v3990_v35 = vld [vmem:[#allocation5 + $0x530] ss:$12 sps:$4 sm:$0xff]  }
 0x15b   :  { %2036 = vmatprep.subr.bf16.mxu0 %v3938_v37  ;;  %3517 = vmatprep.subr.bf16.mxu1 %v3939_v38  ;;  %v3993_v36 = vld [vmem:[#allocation5 + $0x3c4] ss:$12 sps:$4 sm:$0xff]   ;;  %v3991_v37 = vld [vmem:[#allocation5 + $0x3c0] ss:$12 sps:$4 sm:$0xff]   ;;  %v3996_v38 = vld [vmem:[#allocation5 + $0x3dc] ss:$12 sps:$4 sm:$0xff]  }
 0x15e   :  { %2037 = vmatpush1.bf16.msra.mxu0 %v3936_v43  ;;  %3518 = vmatpush3.bf16.msra.mxu1 %v3940_v44  ;;  %v654_v50 = vpop.f32.mrb[8].mxu1  ;;  %v3997_v43 = vld [vmem:[#allocation5 + $0x3f0] ss:$12 sps:$4 sm:$0xff]   ;;  %v4002_v44 = vld [vmem:[#allocation5 + $0x40c] ss:$12 sps:$4 sm:$0xff]  }
 0x15f   :  { %2038 = vmatprep.subr.bf16.mxu0 %v3943_v45  ;;  %3519 = vmatprep.subr.bf16.mxu1 %v3944_v2  ;;  %v655_v52 = vadd.f32 %v654_v50, %v158_v46  ;;  %v656_v53 = vpop.f32.mrb[9].mxu1  ;;  %v4000_v45 = vld [vmem:[#allocation5 + $0x408] ss:$12 sps:$4 sm:$0xff]   ;;  %v4005_v2 = vld [vmem:[#allocation5 + $0x424] ss:$12 sps:$4 sm:$0xff]  }
 0x160   :  { %v657_v54 = vadd.f32 %v656_v53, %v162_v47  ;;  %v658_v55 = vpop.f32.mrb[10].mxu1  ;;  %v4009_v50 = vld [vmem:[#allocation5 + $0x450] ss:$12 sps:$4 sm:$0xff]   ;;  %v4015_v53 = vld [vmem:[#allocation5 + $0x480] ss:$12 sps:$4 sm:$0xff]  }
 0x161   :  { %v669_v57 = vmax.f32 %v655_v52, 0.0  ;;  %v659_v59 = vadd.f32 %v658_v55, %v158_v46  ;;  %v660_v60 = vpop.f32.mrb[11].mxu1  ;;  %v4003_v46 = vld [vmem:[#allocation5 + $0x420] ss:$12 sps:$4 sm:$0xff]   ;;  %v4017_v52 = vld [vmem:[#allocation5 + $0x484] ss:$12 sps:$4 sm:$0xff]  }
 0x162   :  { %2039 = vmatpush1.bf16.msra.mxu0 %v3941_v48  ;;  %3520 = vmatpush3.bf16.msra.mxu1 %v3945_v49  ;;  %v670_v62 = vmax.f32 %v657_v54, 0.0  ;;  %v661_v63 = vadd.f32 %v660_v60, %v162_v47  ;;  %v4008_v47 = vld [vmem:[#allocation5 + $0x43c] ss:$12 sps:$4 sm:$0xff]   ;;  %v4006_v48 = vld [vmem:[#allocation5 + $0x438] ss:$12 sps:$4 sm:$0xff]  }
 0x163   :  { %2040 = vmatprep.subr.bf16.mxu0 %v3948_v56  ;;  %3521 = vmatprep.subr.bf16.mxu1 %v3949_v51  ;;  %v677_v4 = vmax.f32 %v659_v59, 0.0  ;;  %v4011_v49 = vld [vmem:[#allocation5 + $0x454] ss:$12 sps:$4 sm:$0xff]   ;;  %v4014_v56 = vld [vmem:[#allocation5 + $0x46c] ss:$12 sps:$4 sm:$0xff]  }
 0x164   :  { %v678_v5 = vmax.f32 %v661_v63, 0.0  ;;  %v4012_v51 = vld [vmem:[#allocation5 + $0x468] ss:$12 sps:$4 sm:$0xff]   ;;  %v4018_v55 = vld [vmem:[#allocation5 + $0x498] ss:$12 sps:$4 sm:$0xff]  }
 0x165   :  { %v4296_v6 = vpack.c.bf16 %v677_v4, %v669_v57  ;;  %v4020_v54 = vld [vmem:[#allocation5 + $0x49c] ss:$12 sps:$4 sm:$0xff]   ;;  %v4023_v57 = vld [vmem:[#allocation5 + $0x4b4] ss:$12 sps:$4 sm:$0xff]   ;;  %v4026_v60 = vld [vmem:[#allocation5 + $0x4cc] ss:$12 sps:$4 sm:$0xff]  }
 0x166   :  { %2041 = vmatpush1.bf16.msra.mxu0 %v3946_v61  ;;  %3522 = vmatpush3.bf16.msra.mxu1 %v3950_v58  ;;  %v4298_v9 = vpack.c.bf16 %v678_v5, %v670_v62  ;;  %v4021_v59 = vld [vmem:[#allocation5 + $0x4b0] ss:$12 sps:$4 sm:$0xff]   ;;  %v4024_v61 = vld [vmem:[#allocation5 + $0x4c8] ss:$12 sps:$4 sm:$0xff]   ;;  %v4027_v62 = vld [vmem:[#allocation5 + $0x4e0] ss:$12 sps:$4 sm:$0xff]  }
 0x167   :  { %2053 = vmatprep.subr.bf16.mxu0 %v3953_v1  ;;  %3529 = vmatprep.subr.bf16.mxu1 %v3954_v3  ;;  %v4029_v58 = vld [vmem:[#allocation5 + $0x4e4] ss:$12 sps:$4 sm:$0xff]   ;;  %v4032_v63 = vld [vmem:[#allocation5 + $0x4fc] ss:$12 sps:$4 sm:$0xff]   ;;  %v4035_v1 = vld [vmem:[#allocation5 + $0x514] ss:$12 sps:$4 sm:$0xff]  }
 0x168   :  { %v4033_v3 = vld [vmem:[#allocation5 + $0x510] ss:$12 sps:$4 sm:$0xff]   ;;  %v4038_v4 = vld [vmem:[#allocation5 + $0x52c] ss:$12 sps:$4 sm:$0xff]   ;;  %v4036_v5 = vld [vmem:[#allocation5 + $0x528] ss:$12 sps:$4 sm:$0xff]  }
 0x169   :  { %2043 = vmatmul.mubr.bf16.vlgmr.msra.gmra.mrb[4].mxu0 %v4288_v17  ;;  %2254 = vmatmul.mubr.bf16.vlgmr.msra.gmra.mrb[20].mxu1 %v4280_v41  ;;  %v3968_v17 = vld [vmem:[#allocation5 + $0x34c] ss:$12 sps:$4 sm:$0xff]  }
 0x16a   :  { %2054 = vmatpush1.bf16.msra.mxu0 %v3951_v7  ;;  %3530 = vmatpush3.bf16.msra.mxu1 %v3955_v8  ;;  %v4041_v7 = vld [vmem:[#allocation5 + $0x544] ss:$12 sps:$4 sm:$0xff]  }
 0x16b   :  { %2055 = vmatprep.subr.bf16.mxu0 %v3958_v10  ;;  %3531 = vmatprep.subr.bf16.mxu1 %v3959_v11  ;;  %v4310_v8 = vld [vmem:[%s4561_s0] sm:$0xff]  ;;  %v4044_v10 = vld [vmem:[#allocation5 + $0x55c] ss:$12 sps:$4 sm:$0xff]  }
 0x16c   :  { %2294 = vmatprep.mubr.bf16.mxu1 %v4298_v9  ;;  %2085 = vmatprep.mubr.bf16.mxu0 %v4282_v42  ;;  %v3975_v42 = vld [vmem:[#allocation5 + $0x4e8] ss:$12 sps:$4 sm:$0xff]  }
 0x16d   :  { %2321 = vrot.lane.b32.xlu0 %v4310_v8, %s4164_s21  ;;  %v4316_v11 = vld [vmem:[%s4561_s0 + $0x8] sm:$0xff] }
 0x16e   :  { %2056 = vmatpush1.bf16.msra.mxu0 %v3956_v12  ;;  %3532 = vmatpush3.bf16.msra.mxu1 %v3960_v0  ;;  %v4042_v12 = vld [vmem:[#allocation5 + $0x558] ss:$12 sps:$4 sm:$0xff]   ;;  %v4047_v0 = vld [vmem:[#allocation5 + $0x574] ss:$12 sps:$4 sm:$0xff]  }
 0x16f   :  { %2057 = vmatprep.subr.bf16.mxu0 %v3963_v13  ;;  %3533 = vmatprep.subr.bf16.mxu1 %v3964_v14  ;;  %v4045_v13 = vld [vmem:[#allocation5 + $0x570] ss:$12 sps:$4 sm:$0xff]   ;;  %v4050_v14 = vld [vmem:[#allocation5 + $0x58c] ss:$12 sps:$4 sm:$0xff]  }
 0x171   :  { %2323 = vrot.lane.b32.xlu0 %v4316_v11, %s4164_s21 }
 0x172   :  { %2058 = vmatpush1.bf16.msra.mxu0 %v3961_v15  ;;  %3534 = vmatpush3.bf16.msra.mxu1 %v3965_v16  ;;  %v4048_v15 = vld [vmem:[#allocation5 + $0x588] ss:$12 sps:$4 sm:$0xff]   ;;  %v4053_v16 = vld [vmem:[#allocation5 + $0x5a4] ss:$12 sps:$4 sm:$0xff]  }
 0x173   :  { %2059 = vmatprep.subr.bf16.mxu0 %v3968_v17  ;;  %3535 = vmatprep.subr.bf16.mxu1 %v3969_v18  ;;  %v4051_v17 = vld [vmem:[#allocation5 + $0x5a0] ss:$12 sps:$4 sm:$0xff]   ;;  %v4056_v18 = vld [vmem:[#allocation5 + $0x5bc] ss:$12 sps:$4 sm:$0xff]  }
 0x176   :  { %2060 = vmatpush1.bf16.msra.mxu0 %v3966_v19  ;;  %3536 = vmatpush3.bf16.msra.mxu1 %v3970_v20  ;;  %v4054_v19 = vld [vmem:[#allocation5 + $0x5b8] ss:$12 sps:$4 sm:$0xff]   ;;  %v4059_v20 = vld [vmem:[#allocation5 + $0x5d4] ss:$12 sps:$4 sm:$0xff]  }
 0x177   :  { %2061 = vmatprep.subr.bf16.mxu0 %v3973_v21  ;;  %3537 = vmatprep.subr.bf16.mxu1 %v3974_v22  ;;  %v4057_v21 = vld [vmem:[#allocation5 + $0x5d0] ss:$12 sps:$4 sm:$0xff]   ;;  %v4062_v22 = vld [vmem:[#allocation5 + $0x5ec] ss:$12 sps:$4 sm:$0xff]  }
 0x17a   :  { %2062 = vmatpush1.bf16.msra.mxu0 %v3971_v23  ;;  %3538 = vmatpush3.bf16.msra.mxu1 %v3975_v42  ;;  %v4060_v23 = vld [vmem:[#allocation5 + $0x5e8] ss:$12 sps:$4 sm:$0xff]  }
 0x17b   :  { %2063 = vmatprep.subr.bf16.mxu0 %v3978_v24  ;;  %3539 = vmatprep.subr.bf16.mxu1 %v3979_v25 }
 0x17e   :  { %2064 = vmatpush1.bf16.msra.mxu0 %v3976_v26  ;;  %3540 = vmatpush3.bf16.msra.mxu1 %v3980_v27 }
 0x17f   :  { %2065 = vmatprep.subr.bf16.mxu0 %v3983_v28  ;;  %3541 = vmatprep.subr.bf16.mxu1 %v3984_v29  ;;  %v2350_v29 = vld [vmem:[%s4565_s4 + $0x80] sm:$0xff] }
 0x182   :  { %2066 = vmatpush1.bf16.msra.mxu0 %v3981_v30  ;;  %3542 = vmatpush3.bf16.msra.mxu1 %v3985_v31  ;;  %v2351_v30 = vld [vmem:[%s4565_s4 + $0x88] sm:$0xff]  ;;  %v2334_v31 = vld [vmem:[%s4565_s4] sm:$0xff] }
 0x183   :  { %2067 = vmatprep.subr.bf16.mxu0 %v3988_v32  ;;  %3543 = vmatprep.subr.bf16.mxu1 %v3989_v33  ;;  %v3699_v32 = vpack.c.bf16 %v2351_v30, %v2350_v29  ;;  %v2352_v33 = vld [vmem:[%s4565_s4 + $0x90] sm:$0xff] }
 0x186   :  { %2068 = vmatpush1.bf16.msra.mxu0 %v3986_v34  ;;  %3544 = vmatpush3.bf16.msra.mxu1 %v3990_v35  ;;  %v2353_v34 = vld [vmem:[%s4565_s4 + $0x98] sm:$0xff] }
 0x187   :  { %2069 = vmatprep.subr.bf16.mxu0 %v3993_v36  ;;  %v3703_v36 = vpack.c.bf16 %v2353_v34, %v2352_v33  ;;  %3700 = vmatprep.subr.bf16.mxu1 %v3699_v32 }
 0x189   :  { %2295 = vmatmul.mubr.bf16.vlgmr.msra.gmra.mrb[24].mxu1 %v4296_v6 }
 0x18a   :  { %2070 = vmatpush1.bf16.msra.mxu0 %v3991_v37  ;;  %v2336_v37 = vld [vmem:[%s4565_s4 + $0x10] sm:$0xff] }
 0x18b   :  { %2071 = vmatprep.subr.bf16.mxu0 %v3996_v38  ;;  %v2337_v38 = vld [vmem:[%s4565_s4 + $0x18] sm:$0xff] }
 0x18e   :  { %2072 = vmatpush1.bf16.msra.mxu0 %v3994_v39  ;;  %v2354_v39 = vld [vmem:[%s4565_s4 + $0xa0] sm:$0xff] }
 0x18f   :  { %2073 = vmatprep.subr.bf16.mxu0 %v3999_v40  ;;  %v2355_v40 = vld [vmem:[%s4565_s4 + $0xa8] sm:$0xff] }
 0x192   :  { %2074 = vmatpush1.bf16.msra.mxu0 %v3997_v43  ;;  %v3705_v43 = vpack.c.bf16 %v2337_v38, %v2336_v37 }
 0x193   :  { %2075 = vmatprep.subr.bf16.mxu0 %v4002_v44  ;;  %v3707_v44 = vpack.c.bf16 %v2355_v40, %v2354_v39 }
 0x196   :  { %2076 = vmatpush1.bf16.msra.mxu0 %v4000_v45  ;;  %v2338_v45 = vld [vmem:[%s4565_s4 + $0x20] sm:$0xff] }
 0x197   :  { %2077 = vmatprep.subr.bf16.mxu0 %v4005_v2  ;;  %v2339_v2 = vld [vmem:[%s4565_s4 + $0x28] sm:$0xff] }
 0x19a   :  { %2078 = vmatpush1.bf16.msra.mxu0 %v4003_v46  ;;  %v2356_v46 = vld [vmem:[%s4565_s4 + $0xb0] sm:$0xff] }
 0x19b   :  { %2079 = vmatprep.subr.bf16.mxu0 %v4008_v47  ;;  %v2357_v47 = vld [vmem:[%s4565_s4 + $0xb8] sm:$0xff] }
 0x19e   :  { %2080 = vmatpush1.bf16.msra.mxu0 %v4006_v48  ;;  %v3709_v48 = vpack.c.bf16 %v2339_v2, %v2338_v45 }
 0x19f   :  { %2081 = vmatprep.subr.bf16.mxu0 %v4011_v49  ;;  %v3711_v49 = vpack.c.bf16 %v2357_v47, %v2356_v46 }
 0x1a2   :  { %2082 = vmatpush1.bf16.msra.mxu0 %v4009_v50  ;;  %v2340_v50 = vld [vmem:[%s4565_s4 + $0x30] sm:$0xff] }
 0x1a3   :  { %2083 = vmatprep.subr.bf16.mxu0 %v4014_v56  ;;  %v2341_v56 = vld [vmem:[%s4565_s4 + $0x38] sm:$0xff] }
 0x1a6   :  { %2084 = vmatpush1.bf16.msra.mxu0 %v4012_v51  ;;  %v2358_v51 = vld [vmem:[%s4565_s4 + $0xc0] sm:$0xff] }
 0x1a7   :  { %2096 = vmatprep.subr.bf16.mxu0 %v4017_v52  ;;  %v2359_v52 = vld [vmem:[%s4565_s4 + $0xc8] sm:$0xff] }
 0x1a9   :  { %2086 = vmatmul.mubr.bf16.vlgmr.msra.gmra.mrb[4].mxu0 %v4280_v41  ;;  %v4030_v41 = vld [vmem:[#allocation5 + $0x4f8] ss:$12 sps:$4 sm:$0xff]  }
 0x1aa   :  { %2097 = vmatpush1.bf16.msra.mxu0 %v4015_v53  ;;  %2128 = vmatprep.mubr.bf16.mxu0 %v4298_v9  ;;  %v4039_v9 = vld [vmem:[#allocation5 + $0x540] ss:$12 sps:$4 sm:$0xff]   ;;  %v3713_v53 = vpack.c.bf16 %v2341_v56, %v2340_v50 }
 0x1ab   :  { %2098 = vmatprep.subr.bf16.mxu0 %v4020_v54  ;;  %v3715_v54 = vpack.c.bf16 %v2359_v52, %v2358_v51 }
 0x1ae   :  { %2099 = vmatpush1.bf16.msra.mxu0 %v4018_v55  ;;  %v2342_v55 = vld [vmem:[%s4565_s4 + $0x40] sm:$0xff] }
 0x1af   :  { %2100 = vmatprep.subr.bf16.mxu0 %v4023_v57  ;;  %v2343_v57 = vld [vmem:[%s4565_s4 + $0x48] sm:$0xff] }
 0x1b2   :  { %2101 = vmatpush1.bf16.msra.mxu0 %v4021_v59  ;;  %v2360_v59 = vld [vmem:[%s4565_s4 + $0xd0] sm:$0xff] }
 0x1b3   :  { %2102 = vmatprep.subr.bf16.mxu0 %v4026_v60  ;;  %v2361_v60 = vld [vmem:[%s4565_s4 + $0xd8] sm:$0xff] }
 0x1b6   :  { %2103 = vmatpush1.bf16.msra.mxu0 %v4024_v61 }
 0x1b7   :  { %2104 = vmatprep.subr.bf16.mxu0 %v4029_v58  ;;  %v3717_v58 = vpack.c.bf16 %v2343_v57, %v2342_v55 }
 0x1ba   :  { %2105 = vmatpush1.bf16.msra.mxu0 %v4027_v62 }
 0x1bb   :  { %2106 = vmatprep.subr.bf16.mxu0 %v4032_v63  ;;  %v3719_v63 = vpack.c.bf16 %v2361_v60, %v2360_v59 }
 0x1be   :  { %2107 = vmatpush1.bf16.msra.mxu0 %v4030_v41  ;;  %v2344_v41 = vld [vmem:[%s4565_s4 + $0x50] sm:$0xff] }
 0x1bf   :  { %2108 = vmatprep.subr.bf16.mxu0 %v4035_v1  ;;  %v2345_v1 = vld [vmem:[%s4565_s4 + $0x58] sm:$0xff] }
 0x1c2   :  { %2109 = vmatpush1.bf16.msra.mxu0 %v4033_v3 }
 0x1c3   :  { %2110 = vmatprep.subr.bf16.mxu0 %v4038_v4 }
 0x1c6   :  { %2111 = vmatpush1.bf16.msra.mxu0 %v4036_v5  ;;  %v2362_v5 = vld [vmem:[%s4565_s4 + $0xe0] sm:$0xff] }
 0x1c7   :  { %2112 = vmatprep.subr.bf16.mxu0 %v4041_v7  ;;  %v2363_v7 = vld [vmem:[%s4565_s4 + $0xe8] sm:$0xff] }
 0x1ca   :  { %2113 = vmatpush1.bf16.msra.mxu0 %v4039_v9 }
 0x1cb   :  { %2114 = vmatprep.subr.bf16.mxu0 %v4044_v10 }
 0x1ce   :  { %2115 = vmatpush1.bf16.msra.mxu0 %v4042_v12 }
 0x1cf   :  { %2116 = vmatprep.subr.bf16.mxu0 %v4047_v0  ;;  %v3721_v0 = vpack.c.bf16 %v2345_v1, %v2344_v41 }
 0x1d2   :  { %2117 = vmatpush1.bf16.msra.mxu0 %v4045_v13  ;;  %v3723_v13 = vpack.c.bf16 %v2363_v7, %v2362_v5 }
 0x1d3   :  { %2118 = vmatprep.subr.bf16.mxu0 %v4050_v14  ;;  %v2346_v14 = vld [vmem:[%s4565_s4 + $0x60] sm:$0xff] }
 0x1d6   :  { %2119 = vmatpush1.bf16.msra.mxu0 %v4048_v15  ;;  %v2347_v15 = vld [vmem:[%s4565_s4 + $0x68] sm:$0xff] }
 0x1d7   :  { %2120 = vmatprep.subr.bf16.mxu0 %v4053_v16 }
 0x1da   :  { %2121 = vmatpush1.bf16.msra.mxu0 %v4051_v17  ;;  %v3725_v17 = vpack.c.bf16 %v2347_v15, %v2346_v14 }
 0x1db   :  { %2122 = vmatprep.subr.bf16.mxu0 %v4056_v18  ;;  %v2364_v18 = vld [vmem:[%s4565_s4 + $0xf0] sm:$0xff] }
 0x1de   :  { %2123 = vmatpush1.bf16.msra.mxu0 %v4054_v19  ;;  %v2365_v19 = vld [vmem:[%s4565_s4 + $0xf8] sm:$0xff] }
 0x1df   :  { %2124 = vmatprep.subr.bf16.mxu0 %v4059_v20  ;;  %v3727_v20 = vpack.c.bf16 %v2365_v19, %v2364_v18 }
 0x1e2   :  { %2125 = vmatpush1.bf16.msra.mxu0 %v4057_v21  ;;  %v2348_v21 = vld [vmem:[%s4565_s4 + $0x70] sm:$0xff] }
 0x1e3   :  { %2126 = vmatprep.subr.bf16.mxu0 %v4062_v22  ;;  %v2349_v22 = vld [vmem:[%s4565_s4 + $0x78] sm:$0xff] }
 0x1e6   :  { %2127 = vmatpush1.bf16.msra.mxu0 %v4060_v23 }
 0x1e9   :  { %2129 = vmatmul.mubr.bf16.vlgmr.msra.gmra.mrb[4].mxu0 %v4296_v6  ;;  %v2335_v6 = vld [vmem:[%s4565_s4 + $0x8] sm:$0xff]  ;;  %s4165_s4 = smov 60  }
 0x1ea   :  { %v3701_v35 = vpack.c.bf16 %v2335_v6, %v2334_v31 }
 0x1ec   :  { %3702 = vmatpush3.bf16.msra.mxu1 %v3701_v35 }
 0x1ed   :  { %3704 = vmatprep.subr.bf16.mxu1 %v3703_v36 }
 0x1f0   :  { %3706 = vmatpush3.bf16.msra.mxu1 %v3705_v43 }
 0x1f1   :  { %3708 = vmatprep.subr.bf16.mxu1 %v3707_v44 }
 0x1f4   :  { %3710 = vmatpush3.bf16.msra.mxu1 %v3709_v48  ;;  %v4167_v48 = vmov 72  }
 0x1f5   :  { %3712 = vmatprep.subr.bf16.mxu1 %v3711_v49  ;;  %3806 = vset.pattern.permute.xlu0 %v4167_v48  ;;  %v2322_v49 = vpop.permute.xlu0 %2321 }
 0x1f6   :  { %3805 = vset.pattern.permute.xlu1 %v4167_v48  ;;  %v2328_v56 = vsel %vm2327_vm0, %v4310_v8, %v2322_v49 }
 0x1f8   :  { %3714 = vmatpush3.bf16.msra.mxu1 %v3713_v53 }
 0x1f9   :  { %3716 = vmatprep.subr.bf16.mxu1 %v3715_v54  ;;  %v2324_v50 = vpop.permute.xlu0 %2323 }
 0x1fa   :  { %v2329_v53 = vsel %vm2327_vm0, %v4316_v11, %v2324_v50 }
 0x1fc   :  { %v3479_v42 = vpop.f32.mrb[12].mxu1  ;;  %3718 = vmatpush3.bf16.msra.mxu1 %v3717_v58 }
 0x1fd   :  { %v3480_v24 = vpop.f32.mrb[13].mxu1  ;;  %3720 = vmatprep.subr.bf16.mxu1 %v3719_v63 }
 0x1fe   :  { %v3481_v25 = vadd.f32 %v3480_v24, %v3479_v42  ;;  %v3482_v26 = vpop.f32.mrb[14].mxu1  ;;  %v3729_v42 = vpack.c.bf16 %v2349_v22, %v2348_v21  ;;  %v2457_v21 = vld [vmem:[%s4566_s5 + $0x8] sm:$0xff] }
 0x1ff   :  { %v3483_v27 = vpop.f32.mrb[15].mxu1 }
 0x200   :  { %v3484_v28 = vadd.f32 %v3483_v27, %v3482_v26  ;;  %3722 = vmatpush3.bf16.msra.mxu1 %v3721_v0 }
 0x201   :  { %3724 = vmatprep.subr.bf16.mxu1 %v3723_v13 }
 0x204   :  { %3726 = vmatpush3.bf16.msra.mxu1 %v3725_v17 }
 0x205   :  { %3728 = vmatprep.subr.bf16.mxu1 %v3727_v20  ;;  %v2456_v20 = vld [vmem:[%s4566_s5] sm:$0xff] }
 0x206   :  { %v3731_v22 = vpack.c.bf16 %v2457_v21, %v2456_v20  ;;  %v3082_v20 = vld [vmem:[%s4569_s8 + $0x48] sm:$0xff] }
 0x208   :  { %3730 = vmatpush3.bf16.msra.mxu1 %v3729_v42  ;;  %v2459_v42 = vld [vmem:[%s4566_s5 + $0x18] sm:$0xff] }
 0x209   :  { %3732 = vmatprep.subr.bf16.mxu1 %v3731_v22 }
 0x21c   :  { %v3501_v61 = vpop.f32.mrb[16].mxu1 }
 0x21d   :  { %v3502_v62 = vpop.f32.mrb[17].mxu1 }
 0x21e   :  { %v3503_v3 = vadd.f32 %v3502_v62, %v3501_v61  ;;  %v3504_v4 = vpop.f32.mrb[18].mxu1 }
 0x21f   :  { %v3505_v9 = vpop.f32.mrb[19].mxu1 }
 0x220   :  { %v2215_v10 = vadd.f32 %v3503_v3, %v3481_v25  ;;  %v3506_v12 = vadd.f32 %v3505_v9, %v3504_v4 }
 0x222   :  { %v2218_v16 = vadd.f32 %v3506_v12, %v3484_v28 }
 0x23c   :  { %v3523_v23 = vpop.f32.mrb[20].mxu1 }
 0x23d   :  { %v3524_v24 = vpop.f32.mrb[21].mxu1 }
 0x23e   :  { %v3525_v25 = vadd.f32 %v3524_v24, %v3523_v23  ;;  %v3526_v26 = vpop.f32.mrb[22].mxu1  ;;  %v2458_v23 = vld [vmem:[%s4566_s5 + $0x10] sm:$0xff] }
 0x23f   :  { %v3527_v27 = vpop.f32.mrb[23].mxu1  ;;  %v3735_v24 = vpack.c.bf16 %v2459_v42, %v2458_v23 }
 0x240   :  { %v2256_v28 = vadd.f32 %v3525_v25, %v2215_v10  ;;  %v3528_v29 = vadd.f32 %v3527_v27, %v3526_v26 }
 0x242   :  { %v2259_v30 = vadd.f32 %v3528_v29, %v2218_v16 }
 0x25c   :  { %v3545_v31 = vpop.f32.mrb[24].mxu1 }
 0x25d   :  { %v3546_v32 = vpop.f32.mrb[25].mxu1 }
 0x25e   :  { %v3547_v6 = vadd.f32 %v3546_v32, %v3545_v31  ;;  %v3548_v33 = vpop.f32.mrb[26].mxu1 }
 0x25f   :  { %v3549_v34 = vpop.f32.mrb[27].mxu1 }
 0x260   :  { %v2297_v35 = vadd.f32 %v3547_v6, %v2256_v28  ;;  %v3550_v36 = vadd.f32 %v3549_v34, %v3548_v33 }
 0x262   :  { %v3442_v37 = vmul.f32 -1.442695, %v2297_v35  ;;  %v2300_v38 = vadd.f32 %v3550_v36, %v2259_v30  ;;  %v4416_v39 = vand.u32 2147483647, %v2297_v35 }
 0x264   :  { %4063 = vpow2.f32 %v3442_v37  ;;  %v3443_v40 = vmul.f32 -1.442695, %v2300_v38  ;;  %2642 = vrot.lane.b32.xlu0 %v4416_v39, %s4165_s4  ;;  %v4434_v4 = vand.u32 2147483647, %v2300_v38  ;;  %v2814_v34 = vmul.f32 0.125, %v4416_v39 }
 0x265   :  { %v2543_v37 = vld [vmem:[%s4567_s6] sm:$0xf]  ;;  %s4173_s6 = smov [#allocation7]  }
 0x266   :  { %4065 = vpow2.f32 %v3443_v40  ;;  %v2815_v7 = vmul.f32 0.125, %v4434_v4  ;;  %s3173_s25 = sshll.u32 %s4173_s6, 4  ;;  %s3174_s25 = int_to_ptr.vmem [resolvable:$true] %s3173_s25 }
 0x267   :  { %s4129_s26 = scalar_lea.vmem %s3174_s25, 256  ;;  %p4134_p3 = scmp.lt.s32.totalorder %s3174_s25, %s3174_s25 }
 0x268   :  { %p4130_p2 = scmp.ne.s32.totalorder %s3174_s25, %s4129_s26  ;;  %p4135_p4 = scmp.lt.s32.totalorder %s4129_s26, %s4129_s26 }
 0x26a   :  { %p4136_p5 = por %p4135_p4, %p4134_p3 }
 0x26c   :  { %p4137_p6 = pnand %p4136_p5, %p4130_p2 }
 0x26e   :  { %v4064_v43 = vpop.eup %4063 }
 0x26f   :  { %v2313_v44 = vadd.f32 1.0, %v4064_v43  ;;  %v2727_v43 = vld [vmem:[%s4568_s7] sm:$0xff] }
 0x270   :  { %v4066_v45 = vpop.eup %4065 }
 0x271   :  { %4067 = vrcp.f32 %v2313_v44  ;;  %v2314_v2 = vadd.f32 1.0, %v4066_v45  ;;  %v2728_v44 = vld [vmem:[%s4568_s7 + $0x8] sm:$0xff] }
 0x272   :  { %v3739_v45 = vpack.c.bf16 %v2728_v44, %v2727_v43 }
 0x273   :  { %4069 = vrcp.f32 %v2314_v2  ;;  %v2729_v2 = vld [vmem:[%s4568_s7 + $0x10] sm:$0xff] }
 0x274   :  { %3740 = vmatprep.subr.bf16.mxu0 %v3739_v45 }
 0x275   :  { %3742 = vmatpush3.bf16.msra.mxu0 %v3739_v45 }
 0x27b   :  { %v4068_v46 = vpop.eup %4067 }
 0x27c   :  { %2937 = vrot.lane.b32.xlu0 %v4068_v46, %s4166_s3 }
 0x27d   :  { %v4070_v47 = vpop.eup %4069 }
 0x280   :  { %2939 = vrot.lane.b32.xlu0 %v4070_v47, %s4166_s3 }
 0x284   :  { %2945 = vrot.lane.b32.xlu0 %v4068_v46, %s4168_s15  ;;  %v2730_v46 = vld [vmem:[%s4568_s7 + $0x18] sm:$0xff] }
 0x288   :  { %2947 = vrot.lane.b32.xlu0 %v4070_v47, %s4168_s15  ;;  %v3743_v47 = vpack.c.bf16 %v2730_v46, %v2729_v2 }
 0x28a   :  { %3744 = vmatprep.subr.bf16.mxu0 %v3743_v47 }
 0x28b   :  { %3746 = vmatpush3.bf16.msra.mxu0 %v3743_v47 }
 0x28c   :  { %2838 = vrot.lane.b32.xlu0 %v4316_v11, %s4169_s16  ;;  %3660 = vmatprep.subr.msk.mxu0 %vm2551_vm2, %v2543_v37 }
 0x2bc   :  { %v2130_v51 = vpop.f32.mrb[4].mxu0 }
 0x2bd   :  { %v2132_v52 = vpop.f32.mrb[5].mxu0  ;;  %v2330_v57 = vmul.f32 %v2328_v56, %v2130_v51 }
 0x2be   :  { %v2331_v54 = vmul.f32 %v2328_v56, %v2132_v52  ;;  %v2134_v55 = vpop.f32.mrb[6].mxu0 }
 0x2bf   :  { %v2136_v59 = vpop.f32.mrb[7].mxu0  ;;  %v2332_v61 = vmul.f32 %v2329_v53, %v2134_v55  ;;  %v2305_v55 = vadd.f32 1e-10, %v4416_v39 }
 0x2c0   :  { %v2333_v60 = vmul.f32 %v2329_v53, %v2136_v59  ;;  %2430 = vmatprep.mubr.f32.mxu1 %v2331_v54 }
 0x2c1   :  { %2431 = vmatmul.mubr.f32.vlgmr.msra.gmra.mrb[28].mxu1 %v2330_v57  ;;  %v2306_v57 = vadd.f32 1e-10, %v4434_v4 }
 0x2c2   :  { %2435 = vmatprep.mubr.f32.mxu1 %v2333_v60  ;;  %3734 = vmatpush3.bf16.msra.mxu1 %v3731_v22 }
 0x2c3   :  { %3736 = vmatprep.subr.bf16.mxu1 %v3735_v24 }
 0x2c5   :  { %2436 = vmatmul.mubr.f32.gmra.mrb[30].mxu1 %v2332_v61 }
 0x2c6   :  { %3738 = vmatpush3.bf16.msra.mxu1 %v3735_v24 }
 0x2c7   :  { %3639 = vmatprep.subr.msk.mxu1 %vm2551_vm2, %v2543_v37 }
 0x2d6   :  { %v4424_v58 = vpop.permute.xlu0 %2642 }
 0x2ee   :  { %v4426_v62 = vpop.permute.xlu0 %2937 }
 0x2f2   :  { %v4428_v63 = vpop.permute.xlu0 %2939 }
 0x2f6   :  { %v4430_v41 = vpop.permute.xlu0 %2945 }
 0x2fa   :  { %v4432_v1 = vpop.permute.xlu0 %2947 }
 0x2fe   :  { %v2839_v3 = vpop.permute.xlu0 %2838 }
 0x2ff   :  { %v2843_v5 = vsub.f32 %v4316_v11, %v2839_v3 }
 0x301   :  { %2848 = vrot.lane.b32.xlu0 %v2843_v5, %s4170_s17 }
 0x305   :  { %2831 = vperm.xlu0 %3806, %v2815_v7  }
 0x394   :  { %v3583_v9 = vpop.f32.mrb[28].mxu1 }
 0x395   :  { %v3584_v10 = vpop.f32.mrb[29].mxu1 }
 0x396   :  { %v3585_v12 = vadd.f32 %v3584_v10, %v3583_v9  ;;  %v3074_v9 = vld [vmem:[%s4569_s8 + $0x8] sm:$0xff]  ;;  %v3077_v10 = vld [vmem:[%s4569_s8 + $0x20] sm:$0xff] }
 0x398   :  { %v3038_v0 = vmul.f32 %v3585_v12, %v3585_v12  ;;  %v3586_v13 = vpop.f32.mrb[30].mxu1  ;;  %v2441_v14 = vmul.f32 0.17677669, %v3585_v12  ;;  %v3078_v12 = vld [vmem:[%s4569_s8 + $0x28] sm:$0xff] }
 0x399   :  { %v3587_v15 = vpop.f32.mrb[31].mxu1 }
 0x39a   :  { %v3588_v16 = vadd.f32 %v3587_v15, %v3586_v13  ;;  %3050 = vrot.lane.b32.xlu0 %v3038_v0, %s4170_s17  ;;  %v2444_v17 = vsel %vm2443_vm1, %v2441_v14, -inf  ;;  %v3763_v0 = vpack.c.bf16 %v3078_v12, %v3077_v10  ;;  %v3079_v13 = vld [vmem:[%s4569_s8 + $0x30] sm:$0xff] }
 0x39b   :  { %2445 = vmax.xlane.f32.xlu1 %v2444_v17 }
 0x39c   :  { %v2442_v18 = vmul.f32 0.17677669, %v3588_v16  ;;  %v3039_v36 = vmul.f32 %v3588_v16, %v3588_v16 }
 0x39e   :  { %v2447_v19 = vsel %vm2443_vm1, %v2442_v18, -inf }
 0x39f   :  { %2448 = vmax.xlane.f32.xlu1 %v2447_v19  ;;  %v3081_v19 = vld [vmem:[%s4569_s8 + $0x40] sm:$0xff] }
 0x3a0   :  { %v3771_v22 = vpack.c.bf16 %v3082_v20, %v3081_v19 }
 0x3b0   :  { %2644 = vrot.lane.b32.xlu1 %v4434_v4, %s4165_s4  ;;  %v3073_v4 = vld [vmem:[%s4569_s8] sm:$0xff] }
 0x3b4   :  { %2836 = vrot.lane.b32.xlu1 %v4310_v8, %s4169_s16 }
 0x428   :  { %v2446_v25 = vpop.xlane.xlu1 %2445 }
 0x429   :  { %v2450_v26 = vsub.f32 %v2441_v14, %v2446_v25  ;;  %v3080_v14 = vld [vmem:[%s4569_s8 + $0x38] sm:$0xff]  ;;  %v2849_v25 = vpop.permute.xlu0 %2848 }
 0x42a   :  { %v3767_v15 = vpack.c.bf16 %v3080_v14, %v3079_v13 }
 0x42b   :  { %v2452_v27 = vmul.f32 1.442695, %v2450_v26 }
 0x42c   :  { %v2449_v28 = vpop.xlane.xlu1 %2448 }
 0x42d   :  { %4071 = vpow2.f32 %v2452_v27  ;;  %v2451_v29 = vsub.f32 %v2442_v18, %v2449_v28  ;;  %v2832_v43 = vpop.permute.xlu0 %2831 }
 0x42f   :  { %v2454_v30 = vmul.f32 1.442695, %v2451_v29 }
 0x430   :  { %v2645_v31 = vpop.permute.xlu1 %2644 }
 0x431   :  { %4073 = vpow2.f32 %v2454_v30  ;;  %v3051_v2 = vpop.permute.xlu0 %3050 }
 0x434   :  { %v2837_v32 = vpop.permute.xlu1 %2836 }
 0x435   :  { %v2842_v6 = vsub.f32 %v4310_v8, %v2837_v32 }
 0x437   :  { %v4072_v33 = vpop.eup %4071  ;;  %2846 = vrot.lane.b32.xlu1 %v2842_v6, %s4170_s17 }
 0x438   :  { %3636 = vmatprep.mubr.msk.f32.mxu1 %vm2443_vm1, %v4072_v33 }
 0x43b   :  { %v4074_v35 = vpop.eup %4073  ;;  %2826 = vperm.xlu1 %3805, %v2814_v34  }
 0x43c   :  { %3637 = vmatmul.mubr.msk.f32.vlgmr.msra.gmra.mrb[32].mxu1 %vm2443_vm1, %v4074_v35 }
 0x43d   :  { %3640 = vmatpush3.msk.msra.mxu1 %vm2551_vm2, %v2543_v37 }
 0x43e   :  { %3644 = vmatprep.subr.msk.mxu1 %vm2551_vm2, %v2543_v37 }
 0x43f   :  { %2816 = vrot.lane.b32.xlu1 %v4310_v8, %s4170_s17 }
 0x443   :  { %2818 = vrot.lane.b32.xlu1 %v4316_v11, %s4170_s17 }
 0x447   :  { %3052 = vrot.lane.b32.xlu1 %v3039_v36, %s4170_s17 }
 0x4a9   :  { %v2847_v28 = vpop.permute.xlu1 %2846 }
 0x50f   :  { %v3638_v38 = vpop.f32.mrb[32].mxu1 }
 0x510   :  { %v2532_v40 = vpop.f32.mrb[33].mxu1 }
 0x511   :  { %4075 = vrcp.f32 %v2532_v40  ;;  %v2827_v40 = vpop.permute.xlu1 %2826 }
 0x512   :  { %4077 = vrcp.f32 %v3638_v38 }
 0x51b   :  { %v4076_v8 = vpop.eup %4075 }
 0x51c   :  { %v4078_v11 = vpop.eup %4077  ;;  %3641 = vmatprep.mubr.msk.f32.mxu1 %vm2544_vm3, %v4076_v8  ;;  %v2817_v8 = vpop.permute.xlu1 %2816 }
 0x51d   :  { %3642 = vmatmul.mubr.msk.f32.vlgmr.msra.gmra.mrb[34].mxu1 %vm2544_vm3, %v4078_v11 }
 0x51e   :  { %3645 = vmatpush3.msk.msra.mxu1 %vm2551_vm2, %v2543_v37  ;;  %3646 = vmatprep.mubr.msk.f32.mxu1 %vm2544_vm3, %v4424_v58 }
 0x51f   :  { %3748 = vmatprep.subr.bf16.mxu1 %v3739_v45 }
 0x520   :  { %v2819_v11 = vpop.permute.xlu1 %2818 }
 0x521   :  { %3647 = vmatmul.mubr.msk.f32.vlgmr.msra.gmra.mrb[36].mxu1 %vm2544_vm3, %v2645_v31 }
 0x522   :  { %3750 = vmatpush3.bf16.msra.mxu1 %v3739_v45 }
 0x523   :  { %3752 = vmatprep.subr.bf16.mxu1 %v3743_v47 }
 0x524   :  { %v3053_v44 = vpop.permute.xlu1 %3052 }
 0x526   :  { %3754 = vmatpush3.bf16.msra.mxu1 %v3743_v47 }
 0x5f0   :  { %v3643_v48 = vpop.f32.mrb[34].mxu1 }
 0x5f1   :  { %v2621_v49 = vpop.f32.mrb[35].mxu1  ;;  %v4493_v50 = vmul.f32 %v4074_v35, %v3643_v48 }
 0x5f2   :  { %v4495_v56 = vmul.f32 %v4072_v33, %v2621_v49 }
 0x5f3   :  { %v2633_v16 = vadd.f32 1e-08, %v4493_v50 }
 0x5f4   :  { %v3648_v51 = vpop.f32.mrb[36].mxu1  ;;  %v2632_v17 = vadd.f32 1e-08, %v4495_v56 }
 0x5f5   :  { %v2726_v52 = vmul.f32 %v3648_v51, %v4493_v50  ;;  %v2716_v53 = vpop.f32.mrb[37].mxu1  ;;  %4079 = vlog2.f32 %v2633_v16 }
 0x5f6   :  { %v2725_v54 = vmul.f32 %v2716_v53, %v4495_v56  ;;  %4081 = vlog2.f32 %v2632_v17 }
 0x5f8   :  { %3657 = vmatprep.mubr.msk.f32.mxu0 %vm2443_vm1, %v2725_v54 }
 0x5f9   :  { %3658 = vmatmul.mubr.msk.f32.vlgmr.msra.gmra.mrb[8].mxu0 %vm2443_vm1, %v2726_v52 }
 0x5fa   :  { %3661 = vmatpush3.msk.msra.mxu0 %vm2551_vm2, %v2543_v37  ;;  %3662 = vmatprep.mubr.msk.f32.mxu0 %vm2544_vm3, %v2305_v55 }
 0x5fd   :  { %3663 = vmatmul.mubr.msk.f32.vlgmr.msra.gmra.mrb[10].mxu0 %vm2544_vm3, %v2306_v57 }
 0x5ff   :  { %v4080_v24 = vpop.eup %4079 }
 0x600   :  { %v4082_v27 = vpop.eup %4081  ;;  %v2637_v34 = vmul.f32 0.6931472, %v4080_v24 }
 0x601   :  { %v2635_v36 = vmul.f32 0.6931472, %v4082_v27 }
 0x602   :  { %v2639_v37 = vmul.f32 %v2637_v34, %v4493_v50 }
 0x603   :  { %v2638_v38 = vmul.f32 %v2635_v36, %v4495_v56 }
 0x6cc   :  { %v3659_v59 = vpop.f32.mrb[8].mxu0 }
 0x6cd   :  { %v2803_v60 = vpop.f32.mrb[9].mxu0  ;;  %v2809_v18 = vadd.f32 1e-10, %v3659_v59 }
 0x6ce   :  { %v2804_v21 = vadd.f32 1e-10, %v2803_v60 }
 0x6cf   :  { %v2813_v23 = vand.u32 2147483647, %v2809_v18 }
 0x6d0   :  { %v3664_v61 = vpop.f32.mrb[10].mxu0  ;;  %v2812_v42 = vand.u32 2147483647, %v2804_v21 }
 0x6d1   :  { %v2944_v58 = vmul.f32 %v3664_v61, %v4428_v63  ;;  %v2926_v3 = vpop.f32.mrb[11].mxu0  ;;  %v3755_v63 = vpack.c.bf16 %v3074_v9, %v3073_v4  ;;  %v2853_v29 = vmul.f32 %v2849_v25, %v2813_v23  ;;  %v2823_v46 = vmul.f32 %v2819_v11, %v2813_v23 }
 0x6d2   :  { %v2943_v5 = vmul.f32 %v4426_v62, %v2926_v3  ;;  %v3075_v62 = vld [vmem:[%s4569_s8 + $0x10] sm:$0xff]  ;;  %v2852_v32 = vmul.f32 %v2847_v28, %v2812_v42  ;;  %v2822_v45 = vmul.f32 %v2817_v8, %v2812_v42 }
 0x6d3   :  { %v2952_v7 = vmul.f32 %v4432_v1, %v2944_v58  ;;  %3756 = vmatprep.subr.bf16.mxu1 %v3755_v63  ;;  %v2835_v49 = vadd.f32 %v2832_v43, %v2823_v46 }
 0x6d4   :  { %v2951_v39 = vmul.f32 %v4430_v41, %v2943_v5  ;;  %v3076_v41 = vld [vmem:[%s4569_s8 + $0x18] sm:$0xff]  ;;  %s4171_s8 = smov 8   ;;  %v2834_v47 = vadd.f32 %v2827_v40, %v2822_v45 }
 0x6d5   :  { %v3759_v1 = vpack.c.bf16 %v3076_v41, %v3075_v62 }
 0x6d6   :  { %3673 = vmatprep.mubr.msk.f32.mxu1 %vm2443_vm1, %v2951_v39 }
 0x6d7   :  { %3674 = vmatmul.mubr.msk.f32.vlgmr.msra.gmra.mrb[38].mxu1 %vm2443_vm1, %v2952_v7 }
 0x6d8   :  { %3758 = vmatpush3.bf16.msra.mxu1 %v3755_v63 }
 0x6d9   :  { %3760 = vmatprep.subr.bf16.mxu1 %v3759_v1 }
 0x6dc   :  { %3762 = vmatpush3.bf16.msra.mxu1 %v3759_v1 }
 0x6dd   :  { %3764 = vmatprep.subr.bf16.mxu1 %v3763_v0 }
 0x6e0   :  { %3766 = vmatpush3.bf16.msra.mxu1 %v3763_v0 }
 0x6e1   :  { %3768 = vmatprep.subr.bf16.mxu1 %v3767_v15 }
 0x6e4   :  { %3770 = vmatpush3.bf16.msra.mxu1 %v3767_v15 }
 0x6e5   :  { %3772 = vmatprep.subr.bf16.mxu1 %v3771_v22 }
 0x6e8   :  { %3774 = vmatpush3.bf16.msra.mxu1 %v3771_v22 }
 0x7aa   :  { %v3675_v26 = vpop.f32.mrb[38].mxu1 }
 0x7ab   :  { %v3460_v30 = vadd.f32 -1.0, %v3675_v26  ;;  %v3025_v31 = vpop.f32.mrb[39].mxu1 }
 0x7ac   :  { %v3459_v6 = vadd.f32 -1.0, %v3025_v31 }
 0x7ad   :  { %v3037_v33 = vmul.f32 %v3460_v30, %v2853_v29 }
 0x7ae   :  { %v3036_v35 = vmul.f32 %v3459_v6, %v2852_v32 }
 0x7af   :  { %3044 = vrot.lane.b32.xlu1 %v3037_v33, %s4171_s8 }
 0x7b0   :  { %3042 = vrot.lane.b32.xlu0 %v3036_v35, %s4171_s8 }
 0x7b3   :  { %3060 = vrot.lane.b32.xlu1 %v2639_v37, %s4172_s24 }
 0x7b4   :  { %3058 = vrot.lane.b32.xlu0 %v2638_v38, %s4172_s24 }
 0x821   :  { %v3045_v48 = vpop.permute.xlu1 %3044 }
 0x822   :  { %v3043_v51 = vpop.permute.xlu0 %3042  ;;  %v3066_v50 = vsel %vm3064_vm4, %v2835_v49, %v3045_v48 }
 0x823   :  { %v3065_v52 = vsel %vm3064_vm4, %v2834_v47, %v3043_v51  ;;  %v3069_v55 = vsel %vm3067_vm5, %v3066_v50, %v3053_v44 }
 0x824   :  { %v3068_v54 = vsel %vm3067_vm5, %v3065_v52, %v3051_v2 }
 0x825   :  { %v3061_v56 = vpop.permute.xlu1 %3060 }
 0x826   :  { %v3059_v53 = vpop.permute.xlu0 %3058  ;;  %v3072_v59 = vsel %vm3070_vm6, %v3069_v55, %v3061_v56 }
 0x827   :  { %v3071_v57 = vsel %vm3070_vm6, %v3068_v54, %v3059_v53 }
 0x828   :  { %3696 = vmatprep.mubr.msk.f32.mxu1 %vm3083_vm7, %v3071_v57 }
 0x829   :  { %3697 = vmatmul.mubr.msk.f32.vlgmr.msra.gmra.mrb[40].mxu1 %vm3083_vm7, %v3072_v59 }
 0x8fc   :  { %v3698_v60 = vpop.f32.mrb[40].mxu1 }
 0x8fd   :  { %3167 = vst.msk [vmem:[#allocation7 + $0x8] sm:$0xff] %vm3165_vm8, %v3698_v60  ;;  %v3156_v61 = vpop.f32.mrb[41].mxu1 }
 0x8fe   :  { %3166 = vst.msk [vmem:[#allocation7] sm:$0xff] %vm3165_vm8, %v3156_v61 }
 0x8ff   :  { %4140 = shalt.err (!%p4137_p6)
}
 0x900   :  { %s4141_s29 = scalar_lea.hbm %s4570_s9, 256 }
 0x901   :  { %p4142_p7 = scmp.ne.s32.totalorder %s4570_s9, %s4141_s29  ;;  %p4145_p8 = scmp.lt.u32.totalorder %s4141_s29, %s4570_s9 }
 0x903   :  { %p4147_p9 = pnand %p4145_p8, %p4142_p7 }
 0x905   :  { %4150 = shalt.err (!%p4147_p9)
}
 0x906   :  { %s4174_s1 = smov 128  }
 0x907   :  { %3179 = dma.vmem_to_hbm [thread:$0]  %s3174_s25, 256, %s4570_s9, [#allocation4], %s4174_s1, %s4174_s1, %s4171_s8  }
 0x908   :  { %4155 = dma.done.wait [#allocation4], 256  }
 0x909   :  { %4156 = vsyncadd [#allocation4], 4294967040 }
 0x90a   :  { %3183 = vsyncpa [#allocation3], 1 }
 0x90b   :  { %3184 = vsyncpa [#allocation6], 1 }
 0x90c   :  { %3185 = vsyncpa [#allocation4], 1 }

</bundles_post_ra>
